<compile_context>
chip_gen: v7x
topology: tpu7x:2x2x1
jax: 0.10.0
libtpu: 0.0.40
codegen_flags: <defaults>
</compile_context>

<pallas_src>
import numpy as np

import jax
import jax.numpy as jnp
from jax.experimental import pallas as pl
from jax.experimental.pallas import tpu as pltpu

# ---- sizes consistent with the module -------------------------------------
B = 2              # batch
C = 4              # image channels
H = W = 16         # spatial
NUM_CLASSES = 16   # args.num_classes
NBRANCH = 5
FF_IN = NUM_CLASSES * NBRANCH   # 80
HIDDEN = 256
OUT_DIM = 16

# packed-parameter slab geometry
WBIG_ROWS = FF_IN + HIDDEN      # 336: rows 0:80 = w1, rows 80:336 = [w2 | w3]
WBIG_COLS = HIDDEN + OUT_DIM    # 272
SML_ROWS = 8                    # (8, 256) f32: backbone stub w/b + head biases


# ---------------------------------------------------------------------------
# Fused kernel: backbone stubs + softmax x5 + (implicit) concat + MLP head
# ---------------------------------------------------------------------------
def fused_kernel(wbig_ref, wsml_ref,
                 xhol_ref, xhdr_ref, xftr_ref, xlft_ref, xrgt_ref, out_ref):
    """Whole DocClassificationRest forward in one kernel invocation.

    wbig_ref : (336, 272) bf16  rows 0:80            = ff1 weight (5 x 16-row blocks)
                                rows 80:336, 0:256   = ff2 weight
                                rows 80:336, 256:272 = output weight
    wsml_ref : (8, 256)   f32   rows 0:4, cols 0:16  = densenet stub weight / HW
                                rows 0:4, cols 16:32 = holistic stub weight / HW
                                row 4,   cols 0:16 / 16:32 = stub biases
                                row 5 = ff1 bias, row 6 = ff2 bias,
                                row 7, cols 0:16 = output bias
    x*_ref   : (B, C, H, W) f32 raw branch images
    out_ref  : (B, 16)      f32 relu(output)
    """

    def branch_probs(x_ref, col0):
        # Backbone stub: GAP (1/HW folded into the weight) + Linear + softmax.
        x = x_ref[...]                                        # (B, C, H, W) f32
        g = jnp.sum(jnp.sum(x, axis=-1), axis=-1)             # (B, C) f32
        w = wsml_ref[0:C, col0:col0 + NUM_CLASSES]            # (C, 16) f32 (pre /HW)
        b = wsml_ref[C:C + 1, col0:col0 + NUM_CLASSES]        # (1, 16) f32
        # K=4 contraction as 4 broadcasted FMAs on the VPU (no MXU push needed).
        logits = b
        for c in range(C):
            logits = logits + g[:, c:c + 1] * w[c:c + 1, :]   # (B, 16) f32
        m = jnp.max(logits, axis=-1, keepdims=True)
        e = jnp.exp(logits - m)
        s = jnp.sum(e, axis=-1, keepdims=True)
        return e * pl.reciprocal(s, approx=True)              # (B, 16) f32

    probs = (branch_probs(xhol_ref, 0),                       # densenet121 stub
             branch_probs(xhdr_ref, NUM_CLASSES),             # holistic stub x4
             branch_probs(xftr_ref, NUM_CLASSES),
             branch_probs(xlft_ref, NUM_CLASSES),
             branch_probs(xrgt_ref, NUM_CLASSES))

    # ff1: torch.cat(probs, dim=1) @ w1  ==  sum_g probs[g] @ w1[16g:16(g+1)]
    # (dropout p=0.75 = identity in eval)
    acc = wsml_ref[5:6, :]                                    # ff1 bias (1, 256) f32
    for g in range(NBRANCH):
        w1g = wbig_ref[g * NUM_CLASSES:(g + 1) * NUM_CLASSES, 0:HIDDEN]
        acc = acc + jnp.dot(probs[g].astype(jnp.bfloat16), w1g,
                            preferred_element_type=jnp.float32)
    h1 = jnp.maximum(acc, 0.0)                                # (B, 256) f32

    # ff2 (dropout = identity in eval)
    h2 = jnp.dot(h1.astype(jnp.bfloat16),
                 wbig_ref[FF_IN:FF_IN + HIDDEN, 0:HIDDEN],
                 preferred_element_type=jnp.float32) + wsml_ref[6:7, :]
    h2 = jnp.maximum(h2, 0.0)                                 # (B, 256) f32

    # output head
    o = jnp.dot(h2.astype(jnp.bfloat16),
                wbig_ref[FF_IN:FF_IN + HIDDEN, HIDDEN:HIDDEN + OUT_DIM],
                preferred_element_type=jnp.float32) + wsml_ref[7:8, 0:OUT_DIM]
    out_ref[...] = jnp.maximum(o, 0.0)                        # (B, 16) f32


# ---------------------------------------------------------------------------
# One-time parameter packing into 2 kernel-ready slabs.
# ---------------------------------------------------------------------------
def pack_params(params):
    inv_hw = 1.0 / float(H * W)          # exact power-of-two scaling

    wsml = jnp.zeros((SML_ROWS, HIDDEN), jnp.float32)
    wsml = wsml.at[0:C, 0:NUM_CLASSES].set(params["dnet_w"] * inv_hw)
    wsml = wsml.at[0:C, NUM_CLASSES:2 * NUM_CLASSES].set(params["hol_w"] * inv_hw)
    wsml = wsml.at[C, 0:NUM_CLASSES].set(params["dnet_b"][0])
    wsml = wsml.at[C, NUM_CLASSES:2 * NUM_CLASSES].set(params["hol_b"][0])
    wsml = wsml.at[5, :].set(params["b1"][0])
    wsml = wsml.at[6, :].set(params["b2"][0])
    wsml = wsml.at[7, 0:OUT_DIM].set(params["b3"][0])

    wbig = jnp.zeros((WBIG_ROWS, WBIG_COLS), jnp.float32)
    wbig = wbig.at[0:FF_IN, 0:HIDDEN].set(params["w1"])
    wbig = wbig.at[FF_IN:, 0:HIDDEN].set(params["w2"])
    wbig = wbig.at[FF_IN:, HIDDEN:HIDDEN + OUT_DIM].set(params["w3"])

    # The kernel reads only exact-size named sub-blocks of both slabs, so no
    # result depends on the zero filler (removes the implicit-coupling hazard).
    assert wsml.shape == (SML_ROWS, HIDDEN)
    assert wbig.shape == (WBIG_ROWS, WBIG_COLS)

    return dict(wbig=wbig.astype(jnp.bfloat16), wsml=wsml)


# ---------------------------------------------------------------------------
# Forward wrapper: no input prep at all — raw images go straight to the kernel.
# ---------------------------------------------------------------------------
@jax.jit
def doc_classification_rest_forward(packed, batch_holistic, batch_header,
                                    batch_footer, batch_left_body,
                                    batch_right_body):
    vmem = pl.BlockSpec(memory_space=pltpu.MemorySpace.VMEM)
    # Parameter refs first so their DMAs are issued ahead of the activations.
    return pl.pallas_call(
        fused_kernel,
        out_shape=jax.ShapeDtypeStruct((B, OUT_DIM), jnp.float32),
        in_specs=[vmem] * 7,
        out_specs=vmem,
    )(packed["wbig"], packed["wsml"], batch_holistic, batch_header,
      batch_footer, batch_left_body, batch_right_body)


# ---------------------------------------------------------------------------
# Pure-JAX reference (f32, exact softmax) for a loose numerical check.
# ---------------------------------------------------------------------------
def reference_forward(params, imgs):
    def backbone(x, w, b):
        gap = jnp.mean(x, axis=(2, 3))                     # (B, C)
        return gap @ w + b                                 # (B, 16)

    logits = [backbone(imgs[0], params["dnet_w"], params["dnet_b"])]
    for x in imgs[1:]:
        logits.append(backbone(x, params["hol_w"], params["hol_b"]))
    probs = [jax.nn.softmax(l, axis=1) for l in logits]
    cat = jnp.concatenate(probs, axis=1)                   # (B, 80)
    h1 = jax.nn.relu(cat @ params["w1"] + params["b1"])
    h2 = jax.nn.relu(h1 @ params["w2"] + params["b2"])
    return jax.nn.relu(h2 @ params["w3"] + params["b3"])   # (B, 16)


# ---------------------------------------------------------------------------
# Deterministic parameter init (PyTorch Linear default: U(-1/sqrt(fan_in), ..))
# ---------------------------------------------------------------------------
def init_params(key):
    def linear(key, fan_in, fan_out):
        kw, kb = jax.random.split(key)
        bound = 1.0 / jnp.sqrt(fan_in)
        w = jax.random.uniform(kw, (fan_in, fan_out), jnp.float32, -bound, bound)
        b = jax.random.uniform(kb, (1, fan_out), jnp.float32, -bound, bound)
        return w, b

    keys = jax.random.split(key, 5)
    dnet_w, dnet_b = linear(keys[0], C, NUM_CLASSES)          # densenet121 stub
    hol_w, hol_b = linear(keys[1], C, NUM_CLASSES)            # holistic stub
    w1, b1 = linear(keys[2], FF_IN, HIDDEN)                   # ff1: 80 -> 256
    w2, b2 = linear(keys[3], HIDDEN, HIDDEN)                  # ff2: 256 -> 256
    w3, b3 = linear(keys[4], HIDDEN, OUT_DIM)                 # output: 256 -> 16
    return dict(dnet_w=dnet_w, dnet_b=dnet_b, hol_w=hol_w, hol_b=hol_b,
                w1=w1, b1=b1, w2=w2, b2=b2, w3=w3, b3=b3)


if __name__ == "__main__":
    key = jax.random.PRNGKey(0)
    pkey, *ikeys = jax.random.split(key, 6)
    params = init_params(pkey)
    packed = pack_params(params)

    imgs = [jax.random.normal(k, (B, C, H, W), jnp.float32) for k in ikeys]

    out = doc_classification_rest_forward(packed, *imgs)
    out = jax.block_until_ready(out)

    assert out.shape == (B, OUT_DIM), out.shape
    assert bool(jnp.all(jnp.isfinite(out)))
    assert bool(jnp.all(out >= 0.0))  # final relu

    # Loose tolerance: bf16 matmuls + approx-reciprocal softmax vs f32 reference.
    ref = reference_forward(params, imgs)
    np.testing.assert_allclose(np.asarray(out), np.asarray(ref),
                               rtol=5e-2, atol=2e-2)

    print("KERNEL_OK")
</pallas_src>

<mosaic_0001>
module attributes {stable_mosaic.version = 11 : i64} {
  func.func @fused_kernel(%arg0: memref<336x272xbf16, #tpu.memory_space<vmem>>, %arg1: memref<8x256xf32, #tpu.memory_space<vmem>>, %arg2: memref<2x4x16x16xf32, #tpu.memory_space<vmem>>, %arg3: memref<2x4x16x16xf32, #tpu.memory_space<vmem>>, %arg4: memref<2x4x16x16xf32, #tpu.memory_space<vmem>>, %arg5: memref<2x4x16x16xf32, #tpu.memory_space<vmem>>, %arg6: memref<2x4x16x16xf32, #tpu.memory_space<vmem>>, %arg7: memref<2x16xf32, #tpu.memory_space<vmem>>) attributes {dimension_semantics = [], scalar_prefetch = 0 : i64, scratch_operands = 0 : i64, tpu.core_type = #tpu.core_type<tc>} {
    %c0 = arith.constant 0 : index
    %c0_0 = arith.constant 0 : index
    %c0_1 = arith.constant 0 : index
    %c0_2 = arith.constant 0 : index
    %0 = vector.load %arg2[%c0, %c0_0, %c0_1, %c0_2] : memref<2x4x16x16xf32, #tpu.memory_space<vmem>>, vector<2x4x16x16xf32>
    %cst = arith.constant dense<0.000000e+00> : vector<2x4x16xf32>
    %1 = vector.multi_reduction <add>, %0, %cst [3] : vector<2x4x16x16xf32> to vector<2x4x16xf32>
    %cst_3 = arith.constant dense<0.000000e+00> : vector<2x4xf32>
    %2 = vector.multi_reduction <add>, %1, %cst_3 [2] : vector<2x4x16xf32> to vector<2x4xf32>
    %c0_4 = arith.constant 0 : index
    %c0_5 = arith.constant 0 : index
    %3 = vector.load %arg1[%c0_4, %c0_5] : memref<8x256xf32, #tpu.memory_space<vmem>>, vector<4x16xf32>
    %c4 = arith.constant 4 : index
    %c0_6 = arith.constant 0 : index
    %4 = vector.load %arg1[%c4, %c0_6] : memref<8x256xf32, #tpu.memory_space<vmem>>, vector<1x16xf32>
    %5 = vector.extract_strided_slice %2 {offsets = [0, 0], sizes = [2, 1], strides = [1, 1]} : vector<2x4xf32> to vector<2x1xf32>
    %6 = vector.extract_strided_slice %3 {offsets = [0, 0], sizes = [1, 16], strides = [1, 1]} : vector<4x16xf32> to vector<1x16xf32>
    %7 = vector.broadcast %5 : vector<2x1xf32> to vector<2x16xf32>
    %8 = vector.broadcast %6 : vector<1x16xf32> to vector<2x16xf32>
    %9 = arith.mulf %7, %8 : vector<2x16xf32>
    %10 = vector.broadcast %4 : vector<1x16xf32> to vector<2x16xf32>
    %11 = arith.addf %10, %9 : vector<2x16xf32>
    %12 = vector.extract_strided_slice %2 {offsets = [0, 1], sizes = [2, 1], strides = [1, 1]} : vector<2x4xf32> to vector<2x1xf32>
    %13 = vector.extract_strided_slice %3 {offsets = [1, 0], sizes = [1, 16], strides = [1, 1]} : vector<4x16xf32> to vector<1x16xf32>
    %14 = vector.broadcast %12 : vector<2x1xf32> to vector<2x16xf32>
    %15 = vector.broadcast %13 : vector<1x16xf32> to vector<2x16xf32>
    %16 = arith.mulf %14, %15 : vector<2x16xf32>
    %17 = arith.addf %11, %16 : vector<2x16xf32>
    %18 = vector.extract_strided_slice %2 {offsets = [0, 2], sizes = [2, 1], strides = [1, 1]} : vector<2x4xf32> to vector<2x1xf32>
    %19 = vector.extract_strided_slice %3 {offsets = [2, 0], sizes = [1, 16], strides = [1, 1]} : vector<4x16xf32> to vector<1x16xf32>
    %20 = vector.broadcast %18 : vector<2x1xf32> to vector<2x16xf32>
    %21 = vector.broadcast %19 : vector<1x16xf32> to vector<2x16xf32>
    %22 = arith.mulf %20, %21 : vector<2x16xf32>
    %23 = arith.addf %17, %22 : vector<2x16xf32>
    %24 = vector.extract_strided_slice %2 {offsets = [0, 3], sizes = [2, 1], strides = [1, 1]} : vector<2x4xf32> to vector<2x1xf32>
    %25 = vector.extract_strided_slice %3 {offsets = [3, 0], sizes = [1, 16], strides = [1, 1]} : vector<4x16xf32> to vector<1x16xf32>
    %26 = vector.broadcast %24 : vector<2x1xf32> to vector<2x16xf32>
    %27 = vector.broadcast %25 : vector<1x16xf32> to vector<2x16xf32>
    %28 = arith.mulf %26, %27 : vector<2x16xf32>
    %29 = arith.addf %23, %28 : vector<2x16xf32>
    %cst_7 = arith.constant dense<0xFF800000> : vector<2xf32>
    %30 = vector.multi_reduction <maximumf>, %29, %cst_7 [1] : vector<2x16xf32> to vector<2xf32>
    %31 = vector.shape_cast %30 : vector<2xf32> to vector<2x1xf32>
    %32 = vector.broadcast %31 : vector<2x1xf32> to vector<2x16xf32>
    %33 = arith.subf %29, %32 : vector<2x16xf32>
    %34 = math.exp %33 : vector<2x16xf32>
    %cst_8 = arith.constant dense<0.000000e+00> : vector<2xf32>
    %35 = vector.multi_reduction <add>, %34, %cst_8 [1] : vector<2x16xf32> to vector<2xf32>
    %36 = vector.shape_cast %35 : vector<2xf32> to vector<2x1xf32>
    %37 = tpu.reciprocal %36 {approx = true} : vector<2x1xf32> -> vector<2x1xf32>
    %38 = vector.broadcast %37 : vector<2x1xf32> to vector<2x16xf32>
    %39 = arith.mulf %34, %38 : vector<2x16xf32>
    %c0_9 = arith.constant 0 : index
    %c0_10 = arith.constant 0 : index
    %c0_11 = arith.constant 0 : index
    %c0_12 = arith.constant 0 : index
    %40 = vector.load %arg3[%c0_9, %c0_10, %c0_11, %c0_12] : memref<2x4x16x16xf32, #tpu.memory_space<vmem>>, vector<2x4x16x16xf32>
    %cst_13 = arith.constant dense<0.000000e+00> : vector<2x4x16xf32>
    %41 = vector.multi_reduction <add>, %40, %cst_13 [3] : vector<2x4x16x16xf32> to vector<2x4x16xf32>
    %cst_14 = arith.constant dense<0.000000e+00> : vector<2x4xf32>
    %42 = vector.multi_reduction <add>, %41, %cst_14 [2] : vector<2x4x16xf32> to vector<2x4xf32>
    %c0_15 = arith.constant 0 : index
    %c16 = arith.constant 16 : index
    %43 = vector.load %arg1[%c0_15, %c16] : memref<8x256xf32, #tpu.memory_space<vmem>>, vector<4x16xf32>
    %c4_16 = arith.constant 4 : index
    %c16_17 = arith.constant 16 : index
    %44 = vector.load %arg1[%c4_16, %c16_17] : memref<8x256xf32, #tpu.memory_space<vmem>>, vector<1x16xf32>
    %45 = vector.extract_strided_slice %42 {offsets = [0, 0], sizes = [2, 1], strides = [1, 1]} : vector<2x4xf32> to vector<2x1xf32>
    %46 = vector.extract_strided_slice %43 {offsets = [0, 0], sizes = [1, 16], strides = [1, 1]} : vector<4x16xf32> to vector<1x16xf32>
    %47 = vector.broadcast %45 : vector<2x1xf32> to vector<2x16xf32>
    %48 = vector.broadcast %46 : vector<1x16xf32> to vector<2x16xf32>
    %49 = arith.mulf %47, %48 : vector<2x16xf32>
    %50 = vector.broadcast %44 : vector<1x16xf32> to vector<2x16xf32>
    %51 = arith.addf %50, %49 : vector<2x16xf32>
    %52 = vector.extract_strided_slice %42 {offsets = [0, 1], sizes = [2, 1], strides = [1, 1]} : vector<2x4xf32> to vector<2x1xf32>
    %53 = vector.extract_strided_slice %43 {offsets = [1, 0], sizes = [1, 16], strides = [1, 1]} : vector<4x16xf32> to vector<1x16xf32>
    %54 = vector.broadcast %52 : vector<2x1xf32> to vector<2x16xf32>
    %55 = vector.broadcast %53 : vector<1x16xf32> to vector<2x16xf32>
    %56 = arith.mulf %54, %55 : vector<2x16xf32>
    %57 = arith.addf %51, %56 : vector<2x16xf32>
    %58 = vector.extract_strided_slice %42 {offsets = [0, 2], sizes = [2, 1], strides = [1, 1]} : vector<2x4xf32> to vector<2x1xf32>
    %59 = vector.extract_strided_slice %43 {offsets = [2, 0], sizes = [1, 16], strides = [1, 1]} : vector<4x16xf32> to vector<1x16xf32>
    %60 = vector.broadcast %58 : vector<2x1xf32> to vector<2x16xf32>
    %61 = vector.broadcast %59 : vector<1x16xf32> to vector<2x16xf32>
    %62 = arith.mulf %60, %61 : vector<2x16xf32>
    %63 = arith.addf %57, %62 : vector<2x16xf32>
    %64 = vector.extract_strided_slice %42 {offsets = [0, 3], sizes = [2, 1], strides = [1, 1]} : vector<2x4xf32> to vector<2x1xf32>
    %65 = vector.extract_strided_slice %43 {offsets = [3, 0], sizes = [1, 16], strides = [1, 1]} : vector<4x16xf32> to vector<1x16xf32>
    %66 = vector.broadcast %64 : vector<2x1xf32> to vector<2x16xf32>
    %67 = vector.broadcast %65 : vector<1x16xf32> to vector<2x16xf32>
    %68 = arith.mulf %66, %67 : vector<2x16xf32>
    %69 = arith.addf %63, %68 : vector<2x16xf32>
    %cst_18 = arith.constant dense<0xFF800000> : vector<2xf32>
    %70 = vector.multi_reduction <maximumf>, %69, %cst_18 [1] : vector<2x16xf32> to vector<2xf32>
    %71 = vector.shape_cast %70 : vector<2xf32> to vector<2x1xf32>
    %72 = vector.broadcast %71 : vector<2x1xf32> to vector<2x16xf32>
    %73 = arith.subf %69, %72 : vector<2x16xf32>
    %74 = math.exp %73 : vector<2x16xf32>
    %cst_19 = arith.constant dense<0.000000e+00> : vector<2xf32>
    %75 = vector.multi_reduction <add>, %74, %cst_19 [1] : vector<2x16xf32> to vector<2xf32>
    %76 = vector.shape_cast %75 : vector<2xf32> to vector<2x1xf32>
    %77 = tpu.reciprocal %76 {approx = true} : vector<2x1xf32> -> vector<2x1xf32>
    %78 = vector.broadcast %77 : vector<2x1xf32> to vector<2x16xf32>
    %79 = arith.mulf %74, %78 : vector<2x16xf32>
    %c0_20 = arith.constant 0 : index
    %c0_21 = arith.constant 0 : index
    %c0_22 = arith.constant 0 : index
    %c0_23 = arith.constant 0 : index
    %80 = vector.load %arg4[%c0_20, %c0_21, %c0_22, %c0_23] : memref<2x4x16x16xf32, #tpu.memory_space<vmem>>, vector<2x4x16x16xf32>
    %cst_24 = arith.constant dense<0.000000e+00> : vector<2x4x16xf32>
    %81 = vector.multi_reduction <add>, %80, %cst_24 [3] : vector<2x4x16x16xf32> to vector<2x4x16xf32>
    %cst_25 = arith.constant dense<0.000000e+00> : vector<2x4xf32>
    %82 = vector.multi_reduction <add>, %81, %cst_25 [2] : vector<2x4x16xf32> to vector<2x4xf32>
    %c0_26 = arith.constant 0 : index
    %c16_27 = arith.constant 16 : index
    %83 = vector.load %arg1[%c0_26, %c16_27] : memref<8x256xf32, #tpu.memory_space<vmem>>, vector<4x16xf32>
    %c4_28 = arith.constant 4 : index
    %c16_29 = arith.constant 16 : index
    %84 = vector.load %arg1[%c4_28, %c16_29] : memref<8x256xf32, #tpu.memory_space<vmem>>, vector<1x16xf32>
    %85 = vector.extract_strided_slice %82 {offsets = [0, 0], sizes = [2, 1], strides = [1, 1]} : vector<2x4xf32> to vector<2x1xf32>
    %86 = vector.extract_strided_slice %83 {offsets = [0, 0], sizes = [1, 16], strides = [1, 1]} : vector<4x16xf32> to vector<1x16xf32>
    %87 = vector.broadcast %85 : vector<2x1xf32> to vector<2x16xf32>
    %88 = vector.broadcast %86 : vector<1x16xf32> to vector<2x16xf32>
    %89 = arith.mulf %87, %88 : vector<2x16xf32>
    %90 = vector.broadcast %84 : vector<1x16xf32> to vector<2x16xf32>
    %91 = arith.addf %90, %89 : vector<2x16xf32>
    %92 = vector.extract_strided_slice %82 {offsets = [0, 1], sizes = [2, 1], strides = [1, 1]} : vector<2x4xf32> to vector<2x1xf32>
    %93 = vector.extract_strided_slice %83 {offsets = [1, 0], sizes = [1, 16], strides = [1, 1]} : vector<4x16xf32> to vector<1x16xf32>
    %94 = vector.broadcast %92 : vector<2x1xf32> to vector<2x16xf32>
    %95 = vector.broadcast %93 : vector<1x16xf32> to vector<2x16xf32>
    %96 = arith.mulf %94, %95 : vector<2x16xf32>
    %97 = arith.addf %91, %96 : vector<2x16xf32>
    %98 = vector.extract_strided_slice %82 {offsets = [0, 2], sizes = [2, 1], strides = [1, 1]} : vector<2x4xf32> to vector<2x1xf32>
    %99 = vector.extract_strided_slice %83 {offsets = [2, 0], sizes = [1, 16], strides = [1, 1]} : vector<4x16xf32> to vector<1x16xf32>
    %100 = vector.broadcast %98 : vector<2x1xf32> to vector<2x16xf32>
    %101 = vector.broadcast %99 : vector<1x16xf32> to vector<2x16xf32>
    %102 = arith.mulf %100, %101 : vector<2x16xf32>
    %103 = arith.addf %97, %102 : vector<2x16xf32>
    %104 = vector.extract_strided_slice %82 {offsets = [0, 3], sizes = [2, 1], strides = [1, 1]} : vector<2x4xf32> to vector<2x1xf32>
    %105 = vector.extract_strided_slice %83 {offsets = [3, 0], sizes = [1, 16], strides = [1, 1]} : vector<4x16xf32> to vector<1x16xf32>
    %106 = vector.broadcast %104 : vector<2x1xf32> to vector<2x16xf32>
    %107 = vector.broadcast %105 : vector<1x16xf32> to vector<2x16xf32>
    %108 = arith.mulf %106, %107 : vector<2x16xf32>
    %109 = arith.addf %103, %108 : vector<2x16xf32>
    %cst_30 = arith.constant dense<0xFF800000> : vector<2xf32>
    %110 = vector.multi_reduction <maximumf>, %109, %cst_30 [1] : vector<2x16xf32> to vector<2xf32>
    %111 = vector.shape_cast %110 : vector<2xf32> to vector<2x1xf32>
    %112 = vector.broadcast %111 : vector<2x1xf32> to vector<2x16xf32>
    %113 = arith.subf %109, %112 : vector<2x16xf32>
    %114 = math.exp %113 : vector<2x16xf32>
    %cst_31 = arith.constant dense<0.000000e+00> : vector<2xf32>
    %115 = vector.multi_reduction <add>, %114, %cst_31 [1] : vector<2x16xf32> to vector<2xf32>
    %116 = vector.shape_cast %115 : vector<2xf32> to vector<2x1xf32>
    %117 = tpu.reciprocal %116 {approx = true} : vector<2x1xf32> -> vector<2x1xf32>
    %118 = vector.broadcast %117 : vector<2x1xf32> to vector<2x16xf32>
    %119 = arith.mulf %114, %118 : vector<2x16xf32>
    %c0_32 = arith.constant 0 : index
    %c0_33 = arith.constant 0 : index
    %c0_34 = arith.constant 0 : index
    %c0_35 = arith.constant 0 : index
    %120 = vector.load %arg5[%c0_32, %c0_33, %c0_34, %c0_35] : memref<2x4x16x16xf32, #tpu.memory_space<vmem>>, vector<2x4x16x16xf32>
    %cst_36 = arith.constant dense<0.000000e+00> : vector<2x4x16xf32>
    %121 = vector.multi_reduction <add>, %120, %cst_36 [3] : vector<2x4x16x16xf32> to vector<2x4x16xf32>
    %cst_37 = arith.constant dense<0.000000e+00> : vector<2x4xf32>
    %122 = vector.multi_reduction <add>, %121, %cst_37 [2] : vector<2x4x16xf32> to vector<2x4xf32>
    %c0_38 = arith.constant 0 : index
    %c16_39 = arith.constant 16 : index
    %123 = vector.load %arg1[%c0_38, %c16_39] : memref<8x256xf32, #tpu.memory_space<vmem>>, vector<4x16xf32>
    %c4_40 = arith.constant 4 : index
    %c16_41 = arith.constant 16 : index
    %124 = vector.load %arg1[%c4_40, %c16_41] : memref<8x256xf32, #tpu.memory_space<vmem>>, vector<1x16xf32>
    %125 = vector.extract_strided_slice %122 {offsets = [0, 0], sizes = [2, 1], strides = [1, 1]} : vector<2x4xf32> to vector<2x1xf32>
    %126 = vector.extract_strided_slice %123 {offsets = [0, 0], sizes = [1, 16], strides = [1, 1]} : vector<4x16xf32> to vector<1x16xf32>
    %127 = vector.broadcast %125 : vector<2x1xf32> to vector<2x16xf32>
    %128 = vector.broadcast %126 : vector<1x16xf32> to vector<2x16xf32>
    %129 = arith.mulf %127, %128 : vector<2x16xf32>
    %130 = vector.broadcast %124 : vector<1x16xf32> to vector<2x16xf32>
    %131 = arith.addf %130, %129 : vector<2x16xf32>
    %132 = vector.extract_strided_slice %122 {offsets = [0, 1], sizes = [2, 1], strides = [1, 1]} : vector<2x4xf32> to vector<2x1xf32>
    %133 = vector.extract_strided_slice %123 {offsets = [1, 0], sizes = [1, 16], strides = [1, 1]} : vector<4x16xf32> to vector<1x16xf32>
    %134 = vector.broadcast %132 : vector<2x1xf32> to vector<2x16xf32>
    %135 = vector.broadcast %133 : vector<1x16xf32> to vector<2x16xf32>
    %136 = arith.mulf %134, %135 : vector<2x16xf32>
    %137 = arith.addf %131, %136 : vector<2x16xf32>
    %138 = vector.extract_strided_slice %122 {offsets = [0, 2], sizes = [2, 1], strides = [1, 1]} : vector<2x4xf32> to vector<2x1xf32>
    %139 = vector.extract_strided_slice %123 {offsets = [2, 0], sizes = [1, 16], strides = [1, 1]} : vector<4x16xf32> to vector<1x16xf32>
    %140 = vector.broadcast %138 : vector<2x1xf32> to vector<2x16xf32>
    %141 = vector.broadcast %139 : vector<1x16xf32> to vector<2x16xf32>
    %142 = arith.mulf %140, %141 : vector<2x16xf32>
    %143 = arith.addf %137, %142 : vector<2x16xf32>
    %144 = vector.extract_strided_slice %122 {offsets = [0, 3], sizes = [2, 1], strides = [1, 1]} : vector<2x4xf32> to vector<2x1xf32>
    %145 = vector.extract_strided_slice %123 {offsets = [3, 0], sizes = [1, 16], strides = [1, 1]} : vector<4x16xf32> to vector<1x16xf32>
    %146 = vector.broadcast %144 : vector<2x1xf32> to vector<2x16xf32>
    %147 = vector.broadcast %145 : vector<1x16xf32> to vector<2x16xf32>
    %148 = arith.mulf %146, %147 : vector<2x16xf32>
    %149 = arith.addf %143, %148 : vector<2x16xf32>
    %cst_42 = arith.constant dense<0xFF800000> : vector<2xf32>
    %150 = vector.multi_reduction <maximumf>, %149, %cst_42 [1] : vector<2x16xf32> to vector<2xf32>
    %151 = vector.shape_cast %150 : vector<2xf32> to vector<2x1xf32>
    %152 = vector.broadcast %151 : vector<2x1xf32> to vector<2x16xf32>
    %153 = arith.subf %149, %152 : vector<2x16xf32>
    %154 = math.exp %153 : vector<2x16xf32>
    %cst_43 = arith.constant dense<0.000000e+00> : vector<2xf32>
    %155 = vector.multi_reduction <add>, %154, %cst_43 [1] : vector<2x16xf32> to vector<2xf32>
    %156 = vector.shape_cast %155 : vector<2xf32> to vector<2x1xf32>
    %157 = tpu.reciprocal %156 {approx = true} : vector<2x1xf32> -> vector<2x1xf32>
    %158 = vector.broadcast %157 : vector<2x1xf32> to vector<2x16xf32>
    %159 = arith.mulf %154, %158 : vector<2x16xf32>
    %c0_44 = arith.constant 0 : index
    %c0_45 = arith.constant 0 : index
    %c0_46 = arith.constant 0 : index
    %c0_47 = arith.constant 0 : index
    %160 = vector.load %arg6[%c0_44, %c0_45, %c0_46, %c0_47] : memref<2x4x16x16xf32, #tpu.memory_space<vmem>>, vector<2x4x16x16xf32>
    %cst_48 = arith.constant dense<0.000000e+00> : vector<2x4x16xf32>
    %161 = vector.multi_reduction <add>, %160, %cst_48 [3] : vector<2x4x16x16xf32> to vector<2x4x16xf32>
    %cst_49 = arith.constant dense<0.000000e+00> : vector<2x4xf32>
    %162 = vector.multi_reduction <add>, %161, %cst_49 [2] : vector<2x4x16xf32> to vector<2x4xf32>
    %c0_50 = arith.constant 0 : index
    %c16_51 = arith.constant 16 : index
    %163 = vector.load %arg1[%c0_50, %c16_51] : memref<8x256xf32, #tpu.memory_space<vmem>>, vector<4x16xf32>
    %c4_52 = arith.constant 4 : index
    %c16_53 = arith.constant 16 : index
    %164 = vector.load %arg1[%c4_52, %c16_53] : memref<8x256xf32, #tpu.memory_space<vmem>>, vector<1x16xf32>
    %165 = vector.extract_strided_slice %162 {offsets = [0, 0], sizes = [2, 1], strides = [1, 1]} : vector<2x4xf32> to vector<2x1xf32>
    %166 = vector.extract_strided_slice %163 {offsets = [0, 0], sizes = [1, 16], strides = [1, 1]} : vector<4x16xf32> to vector<1x16xf32>
    %167 = vector.broadcast %165 : vector<2x1xf32> to vector<2x16xf32>
    %168 = vector.broadcast %166 : vector<1x16xf32> to vector<2x16xf32>
    %169 = arith.mulf %167, %168 : vector<2x16xf32>
    %170 = vector.broadcast %164 : vector<1x16xf32> to vector<2x16xf32>
    %171 = arith.addf %170, %169 : vector<2x16xf32>
    %172 = vector.extract_strided_slice %162 {offsets = [0, 1], sizes = [2, 1], strides = [1, 1]} : vector<2x4xf32> to vector<2x1xf32>
    %173 = vector.extract_strided_slice %163 {offsets = [1, 0], sizes = [1, 16], strides = [1, 1]} : vector<4x16xf32> to vector<1x16xf32>
    %174 = vector.broadcast %172 : vector<2x1xf32> to vector<2x16xf32>
    %175 = vector.broadcast %173 : vector<1x16xf32> to vector<2x16xf32>
    %176 = arith.mulf %174, %175 : vector<2x16xf32>
    %177 = arith.addf %171, %176 : vector<2x16xf32>
    %178 = vector.extract_strided_slice %162 {offsets = [0, 2], sizes = [2, 1], strides = [1, 1]} : vector<2x4xf32> to vector<2x1xf32>
    %179 = vector.extract_strided_slice %163 {offsets = [2, 0], sizes = [1, 16], strides = [1, 1]} : vector<4x16xf32> to vector<1x16xf32>
    %180 = vector.broadcast %178 : vector<2x1xf32> to vector<2x16xf32>
    %181 = vector.broadcast %179 : vector<1x16xf32> to vector<2x16xf32>
    %182 = arith.mulf %180, %181 : vector<2x16xf32>
    %183 = arith.addf %177, %182 : vector<2x16xf32>
    %184 = vector.extract_strided_slice %162 {offsets = [0, 3], sizes = [2, 1], strides = [1, 1]} : vector<2x4xf32> to vector<2x1xf32>
    %185 = vector.extract_strided_slice %163 {offsets = [3, 0], sizes = [1, 16], strides = [1, 1]} : vector<4x16xf32> to vector<1x16xf32>
    %186 = vector.broadcast %184 : vector<2x1xf32> to vector<2x16xf32>
    %187 = vector.broadcast %185 : vector<1x16xf32> to vector<2x16xf32>
    %188 = arith.mulf %186, %187 : vector<2x16xf32>
    %189 = arith.addf %183, %188 : vector<2x16xf32>
    %cst_54 = arith.constant dense<0xFF800000> : vector<2xf32>
    %190 = vector.multi_reduction <maximumf>, %189, %cst_54 [1] : vector<2x16xf32> to vector<2xf32>
    %191 = vector.shape_cast %190 : vector<2xf32> to vector<2x1xf32>
    %192 = vector.broadcast %191 : vector<2x1xf32> to vector<2x16xf32>
    %193 = arith.subf %189, %192 : vector<2x16xf32>
    %194 = math.exp %193 : vector<2x16xf32>
    %cst_55 = arith.constant dense<0.000000e+00> : vector<2xf32>
    %195 = vector.multi_reduction <add>, %194, %cst_55 [1] : vector<2x16xf32> to vector<2xf32>
    %196 = vector.shape_cast %195 : vector<2xf32> to vector<2x1xf32>
    %197 = tpu.reciprocal %196 {approx = true} : vector<2x1xf32> -> vector<2x1xf32>
    %198 = vector.broadcast %197 : vector<2x1xf32> to vector<2x16xf32>
    %199 = arith.mulf %194, %198 : vector<2x16xf32>
    %c5 = arith.constant 5 : index
    %c0_56 = arith.constant 0 : index
    %200 = vector.load %arg1[%c5, %c0_56] : memref<8x256xf32, #tpu.memory_space<vmem>>, vector<1x256xf32>
    %c0_57 = arith.constant 0 : index
    %c0_58 = arith.constant 0 : index
    %201 = vector.load %arg0[%c0_57, %c0_58] : memref<336x272xbf16, #tpu.memory_space<vmem>>, vector<16x256xbf16>
    %202 = arith.truncf %39 : vector<2x16xf32> to vector<2x16xbf16>
    %cst_59 = arith.constant dense<0.000000e+00> : vector<2x256xf32>
    %203 = tpu.matmul %202, %201, %cst_59 {dimension_numbers = #tpu.dot_dimension_numbers<[1], [0], [0], [1], [0, 0, 1, 1], [], []>} : vector<2x16xbf16>, vector<16x256xbf16>, vector<2x256xf32> -> vector<2x256xf32>
    %204 = vector.broadcast %200 : vector<1x256xf32> to vector<2x256xf32>
    %205 = arith.addf %204, %203 : vector<2x256xf32>
    %c16_60 = arith.constant 16 : index
    %c0_61 = arith.constant 0 : index
    %206 = vector.load %arg0[%c16_60, %c0_61] : memref<336x272xbf16, #tpu.memory_space<vmem>>, vector<16x256xbf16>
    %207 = arith.truncf %79 : vector<2x16xf32> to vector<2x16xbf16>
    %cst_62 = arith.constant dense<0.000000e+00> : vector<2x256xf32>
    %208 = tpu.matmul %207, %206, %cst_62 {dimension_numbers = #tpu.dot_dimension_numbers<[1], [0], [0], [1], [0, 0, 1, 1], [], []>} : vector<2x16xbf16>, vector<16x256xbf16>, vector<2x256xf32> -> vector<2x256xf32>
    %209 = arith.addf %205, %208 : vector<2x256xf32>
    %c32 = arith.constant 32 : index
    %c0_63 = arith.constant 0 : index
    %210 = vector.load %arg0[%c32, %c0_63] : memref<336x272xbf16, #tpu.memory_space<vmem>>, vector<16x256xbf16>
    %211 = arith.truncf %119 : vector<2x16xf32> to vector<2x16xbf16>
    %cst_64 = arith.constant dense<0.000000e+00> : vector<2x256xf32>
    %212 = tpu.matmul %211, %210, %cst_64 {dimension_numbers = #tpu.dot_dimension_numbers<[1], [0], [0], [1], [0, 0, 1, 1], [], []>} : vector<2x16xbf16>, vector<16x256xbf16>, vector<2x256xf32> -> vector<2x256xf32>
    %213 = arith.addf %209, %212 : vector<2x256xf32>
    %c48 = arith.constant 48 : index
    %c0_65 = arith.constant 0 : index
    %214 = vector.load %arg0[%c48, %c0_65] : memref<336x272xbf16, #tpu.memory_space<vmem>>, vector<16x256xbf16>
    %215 = arith.truncf %159 : vector<2x16xf32> to vector<2x16xbf16>
    %cst_66 = arith.constant dense<0.000000e+00> : vector<2x256xf32>
    %216 = tpu.matmul %215, %214, %cst_66 {dimension_numbers = #tpu.dot_dimension_numbers<[1], [0], [0], [1], [0, 0, 1, 1], [], []>} : vector<2x16xbf16>, vector<16x256xbf16>, vector<2x256xf32> -> vector<2x256xf32>
    %217 = arith.addf %213, %216 : vector<2x256xf32>
    %c64 = arith.constant 64 : index
    %c0_67 = arith.constant 0 : index
    %218 = vector.load %arg0[%c64, %c0_67] : memref<336x272xbf16, #tpu.memory_space<vmem>>, vector<16x256xbf16>
    %219 = arith.truncf %199 : vector<2x16xf32> to vector<2x16xbf16>
    %cst_68 = arith.constant dense<0.000000e+00> : vector<2x256xf32>
    %220 = tpu.matmul %219, %218, %cst_68 {dimension_numbers = #tpu.dot_dimension_numbers<[1], [0], [0], [1], [0, 0, 1, 1], [], []>} : vector<2x16xbf16>, vector<16x256xbf16>, vector<2x256xf32> -> vector<2x256xf32>
    %221 = arith.addf %217, %220 : vector<2x256xf32>
    %cst_69 = arith.constant 0.000000e+00 : f32
    %222 = vector.broadcast %cst_69 : f32 to vector<2x256xf32>
    %223 = arith.maximumf %221, %222 : vector<2x256xf32>
    %224 = arith.truncf %223 : vector<2x256xf32> to vector<2x256xbf16>
    %c80 = arith.constant 80 : index
    %c0_70 = arith.constant 0 : index
    %225 = vector.load %arg0[%c80, %c0_70] : memref<336x272xbf16, #tpu.memory_space<vmem>>, vector<256x256xbf16>
    %cst_71 = arith.constant dense<0.000000e+00> : vector<2x256xf32>
    %226 = tpu.matmul %224, %225, %cst_71 {dimension_numbers = #tpu.dot_dimension_numbers<[1], [0], [0], [1], [0, 0, 1, 1], [], []>} : vector<2x256xbf16>, vector<256x256xbf16>, vector<2x256xf32> -> vector<2x256xf32>
    %c6 = arith.constant 6 : index
    %c0_72 = arith.constant 0 : index
    %227 = vector.load %arg1[%c6, %c0_72] : memref<8x256xf32, #tpu.memory_space<vmem>>, vector<1x256xf32>
    %228 = vector.broadcast %227 : vector<1x256xf32> to vector<2x256xf32>
    %229 = arith.addf %226, %228 : vector<2x256xf32>
    %cst_73 = arith.constant 0.000000e+00 : f32
    %230 = vector.broadcast %cst_73 : f32 to vector<2x256xf32>
    %231 = arith.maximumf %229, %230 : vector<2x256xf32>
    %232 = arith.truncf %231 : vector<2x256xf32> to vector<2x256xbf16>
    %c80_74 = arith.constant 80 : index
    %c256 = arith.constant 256 : index
    %233 = vector.load %arg0[%c80_74, %c256] : memref<336x272xbf16, #tpu.memory_space<vmem>>, vector<256x16xbf16>
    %cst_75 = arith.constant dense<0.000000e+00> : vector<2x16xf32>
    %234 = tpu.matmul %232, %233, %cst_75 {dimension_numbers = #tpu.dot_dimension_numbers<[1], [0], [0], [1], [0, 0, 1, 1], [], []>} : vector<2x256xbf16>, vector<256x16xbf16>, vector<2x16xf32> -> vector<2x16xf32>
    %c7 = arith.constant 7 : index
    %c0_76 = arith.constant 0 : index
    %235 = vector.load %arg1[%c7, %c0_76] : memref<8x256xf32, #tpu.memory_space<vmem>>, vector<1x16xf32>
    %236 = vector.broadcast %235 : vector<1x16xf32> to vector<2x16xf32>
    %237 = arith.addf %234, %236 : vector<2x16xf32>
    %cst_77 = arith.constant 0.000000e+00 : f32
    %238 = vector.broadcast %cst_77 : f32 to vector<2x16xf32>
    %239 = arith.maximumf %237, %238 : vector<2x16xf32>
    %c0_78 = arith.constant 0 : index
    %c0_79 = arith.constant 0 : index
    %240 = vector.load %arg7[%c0_78, %c0_79] : memref<2x16xf32, #tpu.memory_space<vmem>>, vector<2x16xf32>
    tpu.vector_store %arg7[%c0_78, %c0_79], %239 {strides = array<i32>} : memref<2x16xf32, #tpu.memory_space<vmem>>, vector<2x16xf32>,
    return
  }
}

</mosaic_0001>

<bundles_post_ra>
// kernel: doc_classification_rest_forward.1
= control target key start
LH: loop header
LB: loop body
LE: loop exit
PB: predicated region body
PF: predicated region fallthrough
CT: control target
= control target key end

     0   :  { %vm44_vm0 = vcmask 130048   ;;  %s4280_s0 = inlined_call_operand.vmem [shape: bf16[336,272], index: 0, kind: input, shape index: {}]   ;;  %s4281_s1 = inlined_call_operand.vmem [shape: f32[8,256], index: 1, kind: input, shape index: {}]   ;;  %s4282_s2 = inlined_call_operand.vmem [shape: f32[2,4,16,16], index: 2, kind: input, shape index: {}]   ;;  %s4283_s3 = inlined_call_operand.vmem [shape: f32[2,4,16,16], index: 3, kind: input, shape index: {}]   ;;  %s4284_s4 = inlined_call_operand.vmem [shape: f32[2,4,16,16], index: 4, kind: input, shape index: {}]   ;;  %s4285_s5 = inlined_call_operand.vmem [shape: f32[2,4,16,16], index: 5, kind: input, shape index: {}]   ;;  %s4286_s6 = inlined_call_operand.vmem [shape: f32[2,4,16,16], index: 6, kind: input, shape index: {}]   ;;  %s4287_s7 = inlined_call_operand.hbm [shape: f32[2,16], index: 7, kind: output, shape index: {}]  }
   0x1   :  { %v471_v0 = vld [vmem:[%s4283_s3 + $0x10] sm:$0xff]  ;;  %v469_v1 = vld [vmem:[%s4283_s3] sm:$0xff]  ;;  %v472_v2 = vld [vmem:[%s4283_s3 + $0x18] sm:$0xff] }
   0x2   :  { %v491_v3 = vsel %vm44_vm0, %v471_v0, 0.0  ;;  %v485_v4 = vsel %vm44_vm0, %v469_v1, 0.0  ;;  %v470_v5 = vld [vmem:[%s4283_s3 + $0x8] sm:$0xff]  ;;  %v494_v6 = vsel %vm44_vm0, %v472_v2, 0.0  ;;  %v477_v9 = vld [vmem:[%s4283_s3 + $0x40] sm:$0xff]  ;;  %v480_v12 = vld [vmem:[%s4283_s3 + $0x58] sm:$0xff] }
   0x3   :  { %492 = vadd.xlane.f32.xlu1 %v491_v3  ;;  %486 = vadd.xlane.f32.xlu0 %v485_v4  ;;  %v488_v7 = vsel %vm44_vm0, %v470_v5, 0.0  ;;  %v478_v8 = vld [vmem:[%s4283_s3 + $0x48] sm:$0xff]  ;;  %v509_v11 = vsel %vm44_vm0, %v477_v9, 0.0  ;;  %v479_v13 = vld [vmem:[%s4283_s3 + $0x50] sm:$0xff]  ;;  %v518_v14 = vsel %vm44_vm0, %v480_v12, 0.0  ;;  %v473_v17 = vld [vmem:[%s4283_s3 + $0x20] sm:$0xff] }
   0x4   :  { %v512_v10 = vsel %vm44_vm0, %v478_v8, 0.0  ;;  %v515_v15 = vsel %vm44_vm0, %v479_v13, 0.0  ;;  %v474_v16 = vld [vmem:[%s4283_s3 + $0x28] sm:$0xff]  ;;  %v497_v19 = vsel %vm44_vm0, %v473_v17, 0.0  ;;  %v481_v21 = vld [vmem:[%s4283_s3 + $0x60] sm:$0xff]  ;;  %v476_v24 = vld [vmem:[%s4283_s3 + $0x38] sm:$0xff] }
   0x5   :  { %v500_v18 = vsel %vm44_vm0, %v474_v16, 0.0  ;;  %v482_v20 = vld [vmem:[%s4283_s3 + $0x68] sm:$0xff]  ;;  %v521_v23 = vsel %vm44_vm0, %v481_v21, 0.0  ;;  %v475_v25 = vld [vmem:[%s4283_s3 + $0x30] sm:$0xff]  ;;  %v484_v26 = vld [vmem:[%s4283_s3 + $0x78] sm:$0xff]  ;;  %v506_v28 = vsel %vm44_vm0, %v476_v24, 0.0 }
   0x6   :  { %v524_v22 = vsel %vm44_vm0, %v482_v20, 0.0  ;;  %v483_v27 = vld [vmem:[%s4283_s3 + $0x70] sm:$0xff]  ;;  %v503_v29 = vsel %vm44_vm0, %v475_v25, 0.0  ;;  %v891_v30 = vld [vmem:[%s4284_s4 + $0x8] sm:$0xff]  ;;  %v890_v31 = vld [vmem:[%s4284_s4] sm:$0xff]  ;;  %v530_v32 = vsel %vm44_vm0, %v484_v26, 0.0 }
   0x7   :  { %495 = vadd.xlane.f32.xlu1 %v494_v6  ;;  %489 = vadd.xlane.f32.xlu0 %v488_v7  ;;  %v527_v33 = vsel %vm44_vm0, %v483_v27, 0.0  ;;  %v893_v34 = vld [vmem:[%s4284_s4 + $0x18] sm:$0xff]  ;;  %v892_v35 = vld [vmem:[%s4284_s4 + $0x10] sm:$0xff]  ;;  %v899_v36 = vld [vmem:[%s4284_s4 + $0x48] sm:$0xff]  ;;  %v909_v38 = vsel %vm44_vm0, %v891_v30, 0.0  ;;  %v906_v39 = vsel %vm44_vm0, %v890_v31, 0.0 }
   0x8   :  { %v898_v37 = vld [vmem:[%s4284_s4 + $0x40] sm:$0xff]  ;;  %v915_v40 = vsel %vm44_vm0, %v893_v34, 0.0  ;;  %v912_v41 = vsel %vm44_vm0, %v892_v35, 0.0  ;;  %v933_v42 = vsel %vm44_vm0, %v899_v36, 0.0  ;;  %v901_v44 = vld [vmem:[%s4284_s4 + $0x58] sm:$0xff]  ;;  %v900_v45 = vld [vmem:[%s4284_s4 + $0x50] sm:$0xff] }
   0x9   :  { %v930_v43 = vsel %vm44_vm0, %v898_v37, 0.0  ;;  %v939_v46 = vsel %vm44_vm0, %v901_v44, 0.0  ;;  %v895_v47 = vld [vmem:[%s4284_s4 + $0x28] sm:$0xff]  ;;  %v936_v48 = vsel %vm44_vm0, %v900_v45, 0.0  ;;  %v894_v49 = vld [vmem:[%s4284_s4 + $0x20] sm:$0xff] }
   0xa   :  { %v921_v50 = vsel %vm44_vm0, %v895_v47, 0.0  ;;  %v918_v51 = vsel %vm44_vm0, %v894_v49, 0.0 }
   0xb   :  { %513 = vadd.xlane.f32.xlu1 %v512_v10  ;;  %510 = vadd.xlane.f32.xlu0 %v509_v11 }
   0xf   :  { %519 = vadd.xlane.f32.xlu1 %v518_v14  ;;  %516 = vadd.xlane.f32.xlu0 %v515_v15 }
  0x13   :  { %501 = vadd.xlane.f32.xlu1 %v500_v18  ;;  %498 = vadd.xlane.f32.xlu0 %v497_v19 }
  0x17   :  { %525 = vadd.xlane.f32.xlu1 %v524_v22  ;;  %522 = vadd.xlane.f32.xlu0 %v521_v23 }
  0x1b   :  { %507 = vadd.xlane.f32.xlu1 %v506_v28  ;;  %504 = vadd.xlane.f32.xlu0 %v503_v29 }
  0x1f   :  { %531 = vadd.xlane.f32.xlu1 %v530_v32  ;;  %528 = vadd.xlane.f32.xlu0 %v527_v33 }
  0x23   :  { %910 = vadd.xlane.f32.xlu1 %v909_v38  ;;  %907 = vadd.xlane.f32.xlu0 %v906_v39 }
  0x27   :  { %916 = vadd.xlane.f32.xlu1 %v915_v40  ;;  %913 = vadd.xlane.f32.xlu0 %v912_v41 }
  0x2b   :  { %934 = vadd.xlane.f32.xlu1 %v933_v42  ;;  %931 = vadd.xlane.f32.xlu0 %v930_v43 }
  0x2f   :  { %940 = vadd.xlane.f32.xlu1 %v939_v46  ;;  %937 = vadd.xlane.f32.xlu0 %v936_v48 }
  0x30   :  { %12 = vsyncpa [#allocation3], 0  ;;  %v903_v52 = vld [vmem:[%s4284_s4 + $0x68] sm:$0xff]  ;;  %v902_v53 = vld [vmem:[%s4284_s4 + $0x60] sm:$0xff]  ;;  %vm120_vm1 = vcmask 130112   ;;  %vm185_vm2 = vcmask 1041409  }
  0x31   :  { %v945_v54 = vsel %vm44_vm0, %v903_v52, 0.0  ;;  %v942_v55 = vsel %vm44_vm0, %v902_v53, 0.0  ;;  %v897_v56 = vld [vmem:[%s4284_s4 + $0x38] sm:$0xff]  ;;  %v896_v57 = vld [vmem:[%s4284_s4 + $0x30] sm:$0xff]  ;;  %v1268_v0 = vld [vmem:[%s4285_s5 + $0x8] sm:$0xff]  ;;  %vm187_vm3 = vcmask 1042434  }
  0x32   :  { %v927_v58 = vsel %vm44_vm0, %v897_v56, 0.0  ;;  %v924_v59 = vsel %vm44_vm0, %v896_v57, 0.0  ;;  %v905_v60 = vld [vmem:[%s4284_s4 + $0x78] sm:$0xff]  ;;  %v904_v61 = vld [vmem:[%s4284_s4 + $0x70] sm:$0xff]  ;;  %v1267_v1 = vld [vmem:[%s4285_s5] sm:$0xff]  ;;  %v1286_v2 = vsel %vm44_vm0, %v1268_v0, 0.0 }
  0x33   :  { %922 = vadd.xlane.f32.xlu1 %v921_v50  ;;  %919 = vadd.xlane.f32.xlu0 %v918_v51  ;;  %v951_v62 = vsel %vm44_vm0, %v905_v60, 0.0  ;;  %v948_v63 = vsel %vm44_vm0, %v904_v61, 0.0  ;;  %v1283_v3 = vsel %vm44_vm0, %v1267_v1, 0.0  ;;  %v1270_v4 = vld [vmem:[%s4285_s5 + $0x18] sm:$0xff]  ;;  %v1269_v5 = vld [vmem:[%s4285_s5 + $0x10] sm:$0xff]  ;;  %v1276_v8 = vld [vmem:[%s4285_s5 + $0x48] sm:$0xff] }
  0x34   :  { %v1292_v6 = vsel %vm44_vm0, %v1270_v4, 0.0  ;;  %v1289_v7 = vsel %vm44_vm0, %v1269_v5, 0.0  ;;  %v1275_v9 = vld [vmem:[%s4285_s5 + $0x40] sm:$0xff]  ;;  %v1310_v10 = vsel %vm44_vm0, %v1276_v8, 0.0  ;;  %v1278_v12 = vld [vmem:[%s4285_s5 + $0x58] sm:$0xff]  ;;  %v1277_v13 = vld [vmem:[%s4285_s5 + $0x50] sm:$0xff]  ;;  %v109_v4 = vlaneseq }
  0x35   :  { %v1307_v11 = vsel %vm44_vm0, %v1275_v9, 0.0  ;;  %v1316_v14 = vsel %vm44_vm0, %v1278_v12, 0.0  ;;  %v1313_v15 = vsel %vm44_vm0, %v1277_v13, 0.0  ;;  %v1272_v16 = vld [vmem:[%s4285_s5 + $0x28] sm:$0xff]  ;;  %v1271_v17 = vld [vmem:[%s4285_s5 + $0x20] sm:$0xff]  ;;  %v1274_v24 = vld [vmem:[%s4285_s5 + $0x38] sm:$0xff] }
  0x36   :  { %v1298_v18 = vsel %vm44_vm0, %v1272_v16, 0.0  ;;  %v1295_v19 = vsel %vm44_vm0, %v1271_v17, 0.0  ;;  %v1280_v20 = vld [vmem:[%s4285_s5 + $0x68] sm:$0xff]  ;;  %v1279_v21 = vld [vmem:[%s4285_s5 + $0x60] sm:$0xff]  ;;  %v1273_v25 = vld [vmem:[%s4285_s5 + $0x30] sm:$0xff]  ;;  %v1304_v26 = vsel %vm44_vm0, %v1274_v24, 0.0 }
  0x37   :  { %946 = vadd.xlane.f32.xlu1 %v945_v54  ;;  %943 = vadd.xlane.f32.xlu0 %v942_v55  ;;  %v1322_v22 = vsel %vm44_vm0, %v1280_v20, 0.0  ;;  %v1319_v23 = vsel %vm44_vm0, %v1279_v21, 0.0  ;;  %v1301_v27 = vsel %vm44_vm0, %v1273_v25, 0.0  ;;  %v1282_v28 = vld [vmem:[%s4285_s5 + $0x78] sm:$0xff]  ;;  %v1281_v29 = vld [vmem:[%s4285_s5 + $0x70] sm:$0xff]  ;;  %v1645_v32 = vld [vmem:[%s4286_s6 + $0x8] sm:$0xff] }
  0x38   :  { %v1328_v30 = vsel %vm44_vm0, %v1282_v28, 0.0  ;;  %v1325_v31 = vsel %vm44_vm0, %v1281_v29, 0.0  ;;  %v1644_v33 = vld [vmem:[%s4286_s6] sm:$0xff]  ;;  %v1663_v34 = vsel %vm44_vm0, %v1645_v32, 0.0  ;;  %v1647_v36 = vld [vmem:[%s4286_s6 + $0x18] sm:$0xff]  ;;  %v1646_v37 = vld [vmem:[%s4286_s6 + $0x10] sm:$0xff] }
  0x39   :  { %v1660_v35 = vsel %vm44_vm0, %v1644_v33, 0.0  ;;  %v1669_v38 = vsel %vm44_vm0, %v1647_v36, 0.0  ;;  %v1666_v39 = vsel %vm44_vm0, %v1646_v37, 0.0  ;;  %v1653_v40 = vld [vmem:[%s4286_s6 + $0x48] sm:$0xff]  ;;  %v1652_v41 = vld [vmem:[%s4286_s6 + $0x40] sm:$0xff]  ;;  %v1655_v44 = vld [vmem:[%s4286_s6 + $0x58] sm:$0xff] }
  0x3a   :  { %v1687_v42 = vsel %vm44_vm0, %v1653_v40, 0.0  ;;  %v1684_v43 = vsel %vm44_vm0, %v1652_v41, 0.0  ;;  %v1654_v45 = vld [vmem:[%s4286_s6 + $0x50] sm:$0xff]  ;;  %v1693_v46 = vsel %vm44_vm0, %v1655_v44, 0.0  ;;  %v1649_v48 = vld [vmem:[%s4286_s6 + $0x28] sm:$0xff]  ;;  %v1648_v49 = vld [vmem:[%s4286_s6 + $0x20] sm:$0xff] }
  0x3b   :  { %928 = vadd.xlane.f32.xlu1 %v927_v58  ;;  %925 = vadd.xlane.f32.xlu0 %v924_v59  ;;  %v1690_v47 = vsel %vm44_vm0, %v1654_v45, 0.0  ;;  %v1675_v50 = vsel %vm44_vm0, %v1649_v48, 0.0  ;;  %v1672_v51 = vsel %vm44_vm0, %v1648_v49, 0.0  ;;  %v1657_v52 = vld [vmem:[%s4286_s6 + $0x68] sm:$0xff]  ;;  %v1656_v53 = vld [vmem:[%s4286_s6 + $0x60] sm:$0xff]  ;;  %v1651_v56 = vld [vmem:[%s4286_s6 + $0x38] sm:$0xff] }
  0x3c   :  { %v1699_v54 = vsel %vm44_vm0, %v1657_v52, 0.0  ;;  %v1696_v55 = vsel %vm44_vm0, %v1656_v53, 0.0  ;;  %v1650_v57 = vld [vmem:[%s4286_s6 + $0x30] sm:$0xff]  ;;  %v1681_v58 = vsel %vm44_vm0, %v1651_v56, 0.0  ;;  %v1659_v60 = vld [vmem:[%s4286_s6 + $0x78] sm:$0xff]  ;;  %vm189_vm4 = vcmask 1043459  }
  0x3d   :  { %v1678_v59 = vsel %vm44_vm0, %v1650_v57, 0.0  ;;  %v1658_v61 = vld [vmem:[%s4286_s6 + $0x70] sm:$0xff]  ;;  %vm196_vm5 = vcmask 125952   ;;  %vm683_vm6 = vcmask 261312   ;;  %vm874_vm7 = vcmask 255104   ;;  %s3014_s12 = smov 112  }
  0x3e   :  { %vm457_vm8 = vcmask 123904   ;;  %s3015_s4 = smov [#allocation2]  }
  0x3f   :  { %952 = vadd.xlane.f32.xlu1 %v951_v62  ;;  %949 = vadd.xlane.f32.xlu0 %v948_v63  ;;  %v1705_v62 = vsel %vm44_vm0, %v1659_v60, 0.0  ;;  %v1702_v63 = vsel %vm44_vm0, %v1658_v61, 0.0  ;;  %v3362_v61 = vld [vmem:[%s4281_s1] sm:$0xf]  ;;  %s2772_s21 = sshll.u32 %s3015_s4, 4  ;;  %s2773_s21 = int_to_ptr.vmem [resolvable:$true] %s2772_s21 }
  0x40   :  { %s2989_s22 = scalar_lea.vmem %s2773_s21, 32  ;;  %p2994_p1 = scmp.lt.s32.totalorder %s2773_s21, %s2773_s21 }
  0x41   :  { %p2990_p0 = scmp.ne.s32.totalorder %s2773_s21, %s2989_s22  ;;  %p2995_p2 = scmp.lt.s32.totalorder %s2989_s22, %s2989_s22 }
  0x43   :  { %1287 = vadd.xlane.f32.xlu1 %v1286_v2  ;;  %1284 = vadd.xlane.f32.xlu0 %v1283_v3  ;;  %p2996_p3 = por %p2995_p2, %p2994_p1 }
  0x45   :  { %p2997_p4 = pnand %p2996_p3, %p2990_p0 }
  0x47   :  { %1293 = vadd.xlane.f32.xlu1 %v1292_v6  ;;  %1290 = vadd.xlane.f32.xlu0 %v1289_v7  ;;  %v3312_v7 = vand.u32 127, %v109_v4 }
  0x49   :  { %v115_v8 = vadd.s32 4294967288, %v3312_v7 }
  0x4b   :  { %1311 = vadd.xlane.f32.xlu1 %v1310_v10  ;;  %1308 = vadd.xlane.f32.xlu0 %v1307_v11  ;;  %v3315_v11 = vshrl.u32 %v109_v4, 7 }
  0x4d   :  { %v3318_v12 = vsub.s32 %v115_v8, %v3315_v11  ;;  %v3357_v60 = vsub.s32 0, %v3315_v11 }
  0x4f   :  { %1317 = vadd.xlane.f32.xlu1 %v1316_v14  ;;  %1314 = vadd.xlane.f32.xlu0 %v1313_v15  ;;  %v3322_v15 = vsub.s32 %v3312_v7, %v3315_v11 }
  0x53   :  { %1299 = vadd.xlane.f32.xlu1 %v1298_v18  ;;  %1296 = vadd.xlane.f32.xlu0 %v1295_v19 }
  0x57   :  { %1323 = vadd.xlane.f32.xlu1 %v1322_v22  ;;  %1320 = vadd.xlane.f32.xlu0 %v1319_v23 }
  0x5b   :  { %1305 = vadd.xlane.f32.xlu1 %v1304_v26  ;;  %1302 = vadd.xlane.f32.xlu0 %v1301_v27 }
  0x5f   :  { %1329 = vadd.xlane.f32.xlu1 %v1328_v30  ;;  %1326 = vadd.xlane.f32.xlu0 %v1325_v31 }
  0x63   :  { %1664 = vadd.xlane.f32.xlu1 %v1663_v34  ;;  %1661 = vadd.xlane.f32.xlu0 %v1660_v35 }
  0x67   :  { %1670 = vadd.xlane.f32.xlu1 %v1669_v38  ;;  %1667 = vadd.xlane.f32.xlu0 %v1666_v39 }
  0x6b   :  { %1688 = vadd.xlane.f32.xlu1 %v1687_v42  ;;  %1685 = vadd.xlane.f32.xlu0 %v1684_v43 }
  0x6f   :  { %1694 = vadd.xlane.f32.xlu1 %v1693_v46  ;;  %1691 = vadd.xlane.f32.xlu0 %v1690_v47 }
  0x73   :  { %1676 = vadd.xlane.f32.xlu1 %v1675_v50  ;;  %1673 = vadd.xlane.f32.xlu0 %v1672_v51 }
  0x77   :  { %1700 = vadd.xlane.f32.xlu1 %v1699_v54  ;;  %1697 = vadd.xlane.f32.xlu0 %v1696_v55 }
  0x7b   :  { %1682 = vadd.xlane.f32.xlu1 %v1681_v58  ;;  %1679 = vadd.xlane.f32.xlu0 %v1678_v59 }
  0x7f   :  { %1706 = vadd.xlane.f32.xlu1 %v1705_v62  ;;  %1703 = vadd.xlane.f32.xlu0 %v1702_v63 }
  0x90   :  { %v493_v0 = vpop.xlane.xlu1 %492  ;;  %v487_v1 = vpop.xlane.xlu0 %486 }
  0x91   :  { %v561_v22 = vrot.slane %v493_v0, %v3322_v15  ;;  %v552_v23 = vrot.slane %v487_v1, %v3322_v15  ;;  %v3366_v0 = vrot.slane %v3362_v61, %v3357_v60 }
  0x94   :  { %v496_v2 = vpop.xlane.xlu1 %495  ;;  %v490_v3 = vpop.xlane.xlu0 %489 }
  0x95   :  { %v565_v16 = vrot.slane %v496_v2, %v3318_v12  ;;  %v556_v17 = vrot.slane %v490_v3, %v3318_v12 }
  0x97   :  { %v566_v24 = vsel %vm120_vm1, %v565_v16, %v561_v22  ;;  %v557_v25 = vsel %vm120_vm1, %v556_v17, %v552_v23 }
  0x98   :  { %v514_v5 = vpop.xlane.xlu1 %513  ;;  %v511_v6 = vpop.xlane.xlu0 %510  ;;  %v621_v37 = vsel %vm185_vm2, %v566_v24, %v557_v25 }
  0x99   :  { %v592_v33 = vrot.slane %v514_v5, %v3318_v12  ;;  %v588_v34 = vrot.slane %v511_v6, %v3322_v15 }
  0x9b   :  { %v593_v45 = vsel %vm120_vm1, %v592_v33, %v588_v34 }
  0x9c   :  { %v520_v9 = vpop.xlane.xlu1 %519  ;;  %v517_v10 = vpop.xlane.xlu0 %516 }
  0x9d   :  { %v601_v26 = vrot.slane %v520_v9, %v3318_v12  ;;  %v597_v27 = vrot.slane %v517_v10, %v3322_v15 }
  0x9f   :  { %v602_v38 = vsel %vm120_vm1, %v601_v26, %v597_v27 }
  0xa0   :  { %v502_v13 = vpop.xlane.xlu1 %501  ;;  %v499_v14 = vpop.xlane.xlu0 %498  ;;  %v624_v49 = vsel %vm185_vm2, %v602_v38, %v593_v45 }
  0xa1   :  { %v574_v18 = vrot.slane %v502_v13, %v3318_v12  ;;  %v570_v19 = vrot.slane %v499_v14, %v3322_v15 }
  0xa3   :  { %v575_v32 = vsel %vm120_vm1, %v574_v18, %v570_v19 }
  0xa4   :  { %v526_v20 = vpop.xlane.xlu1 %525  ;;  %v523_v21 = vpop.xlane.xlu0 %522  ;;  %v622_v40 = vsel %vm187_vm3, %v575_v32, %v621_v37 }
  0xa5   :  { %v610_v28 = vrot.slane %v526_v20, %v3318_v12  ;;  %v606_v29 = vrot.slane %v523_v21, %v3322_v15 }
  0xa7   :  { %v611_v44 = vsel %vm120_vm1, %v610_v28, %v606_v29 }
  0xa8   :  { %v508_v30 = vpop.xlane.xlu1 %507  ;;  %v505_v31 = vpop.xlane.xlu0 %504  ;;  %v625_v51 = vsel %vm187_vm3, %v611_v44, %v624_v49  ;;  %v3404_v49 = vsub.s32 2, %v3315_v11 }
  0xa9   :  { %v583_v35 = vrot.slane %v508_v30, %v3318_v12  ;;  %v579_v36 = vrot.slane %v505_v31, %v3322_v15 }
  0xab   :  { %v584_v39 = vsel %vm120_vm1, %v583_v35, %v579_v36 }
  0xac   :  { %v532_v41 = vpop.xlane.xlu1 %531  ;;  %v529_v42 = vpop.xlane.xlu0 %528  ;;  %v623_v43 = vsel %vm189_vm4, %v584_v39, %v622_v40 }
  0xad   :  { %v619_v46 = vrot.slane %v532_v41, %v3318_v12  ;;  %v615_v47 = vrot.slane %v529_v42, %v3322_v15  ;;  %v629_v48 = vsel %vm196_vm5, %v623_v43, 0.0 }
  0xae   :  { %630 = vadd.xlane.f32.xlu0 %v629_v48 }
  0xaf   :  { %v620_v50 = vsel %vm120_vm1, %v619_v46, %v615_v47 }
  0xb0   :  { %v911_v52 = vpop.xlane.xlu1 %910  ;;  %v908_v53 = vpop.xlane.xlu0 %907  ;;  %v626_v54 = vsel %vm189_vm4, %v620_v50, %v625_v51 }
  0xb1   :  { %v632_v55 = vsel %vm196_vm5, %v626_v54, 0.0  ;;  %v977_v1 = vrot.slane %v911_v52, %v3318_v12  ;;  %v973_v2 = vrot.slane %v908_v53, %v3322_v15  ;;  %v3414_v53 = vrot.slane %v3362_v61, %v3404_v49 }
  0xb2   :  { %633 = vadd.xlane.f32.xlu1 %v632_v55  ;;  %v3417_v54 = vsub.s32 3, %v3315_v11 }
  0xb3   :  { %v978_v10 = vsel %vm120_vm1, %v977_v1, %v973_v2 }
  0xb4   :  { %v917_v56 = vpop.xlane.xlu1 %916  ;;  %v914_v57 = vpop.xlane.xlu0 %913 }
  0xb5   :  { %v986_v3 = vrot.slane %v917_v56, %v3318_v12  ;;  %v982_v4 = vrot.slane %v914_v57, %v3322_v15  ;;  %v3423_v56 = vrot.slane %v3362_v61, %v3417_v54 }
  0xb7   :  { %v987_v13 = vsel %vm120_vm1, %v986_v3, %v982_v4 }
  0xb8   :  { %v935_v58 = vpop.xlane.xlu1 %934  ;;  %v932_v59 = vpop.xlane.xlu0 %931  ;;  %v1042_v18 = vsel %vm185_vm2, %v987_v13, %v978_v10 }
  0xb9   :  { %v1013_v31 = vrot.slane %v935_v58, %v3318_v12  ;;  %v1009_v32 = vrot.slane %v932_v59, %v3322_v15 }
  0xbb   :  { %v1014_v39 = vsel %vm120_vm1, %v1013_v31, %v1009_v32 }
  0xbc   :  { %v941_v62 = vpop.xlane.xlu1 %940  ;;  %v938_v63 = vpop.xlane.xlu0 %937 }
  0xbd   :  { %v1022_v33 = vrot.slane %v941_v62, %v3318_v12  ;;  %v1018_v34 = vrot.slane %v938_v63, %v3322_v15  ;;  %v3431_v63 = vsub.s32 1, %v3315_v11 }
  0xbf   :  { %v1023_v40 = vsel %vm120_vm1, %v1022_v33, %v1018_v34  ;;  %v3435_v1 = vrot.slane %v3362_v61, %v3431_v63  ;;  %v29_v33 = vld [vmem:[%s4282_s2 + $0x8] sm:$0xff] }
  0xc0   :  { %v923_v5 = vpop.xlane.xlu1 %922  ;;  %v920_v6 = vpop.xlane.xlu0 %919  ;;  %v1045_v44 = vsel %vm185_vm2, %v1023_v40, %v1014_v39  ;;  %v48_v34 = vsel %vm44_vm0, %v29_v33, 0.0  ;;  %v36_v39 = vld [vmem:[%s4282_s2 + $0x40] sm:$0xff]  ;;  %v42_v33 = vld [vmem:[%s4282_s2 + $0x70] sm:$0xff] }
  0xc1   :  { %v995_v8 = vrot.slane %v923_v5, %v3318_v12  ;;  %v991_v9 = vrot.slane %v920_v6, %v3322_v15 }
  0xc3   :  { %649 = vbcast.lane.b32.xlu1 %v3366_v0, 280  ;;  %v996_v17 = vsel %vm120_vm1, %v995_v8, %v991_v9 }
  0xc4   :  { %v947_v14 = vpop.xlane.xlu1 %946  ;;  %v944_v16 = vpop.xlane.xlu0 %943  ;;  %v1043_v23 = vsel %vm187_vm3, %v996_v17, %v1042_v18 }
  0xc5   :  { %v1031_v37 = vrot.slane %v947_v14, %v3318_v12  ;;  %v1027_v38 = vrot.slane %v944_v16, %v3322_v15 }
  0xc7   :  { %v1032_v43 = vsel %vm120_vm1, %v1031_v37, %v1027_v38 }
  0xc8   :  { %v929_v19 = vpop.xlane.xlu1 %928  ;;  %v926_v20 = vpop.xlane.xlu0 %925  ;;  %v1046_v48 = vsel %vm187_vm3, %v1032_v43, %v1045_v44  ;;  %v69_v44 = vsel %vm44_vm0, %v36_v39, 0.0  ;;  %v87_v39 = vsel %vm44_vm0, %v42_v33, 0.0 }
  0xc9   :  { %v1004_v21 = vrot.slane %v929_v19, %v3318_v12  ;;  %v1000_v22 = vrot.slane %v926_v20, %v3322_v15 }
  0xcb   :  { %v1005_v24 = vsel %vm120_vm1, %v1004_v21, %v1000_v22 }
  0xcc   :  { %v1044_v25 = vsel %vm189_vm4, %v1005_v24, %v1043_v23  ;;  %v953_v27 = vpop.xlane.xlu1 %952  ;;  %v950_v28 = vpop.xlane.xlu0 %949 }
  0xcd   :  { %v1050_v26 = vsel %vm196_vm5, %v1044_v25, 0.0  ;;  %v1040_v41 = vrot.slane %v953_v27, %v3318_v12  ;;  %v1036_v42 = vrot.slane %v950_v28, %v3322_v15  ;;  %v28_v28 = vld [vmem:[%s4282_s2] sm:$0xff] }
  0xce   :  { %1051 = vadd.xlane.f32.xlu0 %v1050_v26 }
  0xcf   :  { %v1041_v47 = vsel %vm120_vm1, %v1040_v41, %v1036_v42 }
  0xd0   :  { %v1288_v29 = vpop.xlane.xlu1 %1287  ;;  %v1285_v30 = vpop.xlane.xlu0 %1284  ;;  %v1047_v50 = vsel %vm189_vm4, %v1041_v47, %v1046_v48 }
  0xd1   :  { %v1053_v55 = vsel %vm196_vm5, %v1047_v50, 0.0  ;;  %v1354_v4 = vrot.slane %v1288_v29, %v3318_v12  ;;  %v1350_v5 = vrot.slane %v1285_v30, %v3322_v15  ;;  %v45_v30 = vsel %vm44_vm0, %v28_v28, 0.0  ;;  %v38_v50 = vld [vmem:[%s4282_s2 + $0x50] sm:$0xff] }
  0xd3   :  { %v1355_v14 = vsel %vm120_vm1, %v1354_v4, %v1350_v5 }
  0xd4   :  { %v1294_v35 = vpop.xlane.xlu1 %1293  ;;  %v1291_v36 = vpop.xlane.xlu0 %1290 }
  0xd5   :  { %v1363_v6 = vrot.slane %v1294_v35, %v3318_v12  ;;  %v1359_v8 = vrot.slane %v1291_v36, %v3322_v15  ;;  %v30_v35 = vld [vmem:[%s4282_s2 + $0x10] sm:$0xff] }
  0xd6   :  { %v51_v38 = vsel %vm44_vm0, %v30_v35, 0.0 }
  0xd7   :  { %v1364_v16 = vsel %vm120_vm1, %v1363_v6, %v1359_v8  ;;  %v40_v6 = vld [vmem:[%s4282_s2 + $0x60] sm:$0xff] }
  0xd8   :  { %v3397_v45 = vpop.xlane.xlu1 %1311  ;;  %v3399_v46 = vpop.xlane.xlu0 %1308  ;;  %v1419_v22 = vsel %vm185_vm2, %v1364_v16, %v1355_v14  ;;  %v81_v16 = vsel %vm44_vm0, %v40_v6, 0.0 }
  0xd9   :  { %v1390_v40 = vrot.slane %v3397_v45, %v3318_v12  ;;  %v1386_v41 = vrot.slane %v3399_v46, %v3322_v15 }
  0xdc   :  { %v3407_v51 = vpop.xlane.xlu1 %1317  ;;  %v3409_v52 = vpop.xlane.xlu0 %1314 }
  0xdd   :  { %v1399_v42 = vrot.slane %v3407_v51, %v3318_v12  ;;  %v1395_v43 = vrot.slane %v3409_v52, %v3322_v15  ;;  %v1391_v51 = vsel %vm120_vm1, %v1390_v40, %v1386_v41  ;;  %v75_v52 = vsel %vm44_vm0, %v38_v50, 0.0  ;;  %v33_v50 = vld [vmem:[%s4282_s2 + $0x28] sm:$0xff] }
  0xe0   :  { %v1300_v57 = vpop.xlane.xlu1 %1299  ;;  %v1297_v58 = vpop.xlane.xlu0 %1296 }
  0xe1   :  { %v1372_v13 = vrot.slane %v1300_v57, %v3318_v12  ;;  %v1368_v61 = vrot.slane %v1297_v58, %v3322_v15 }
  0xe3   :  { %v1373_v21 = vsel %vm120_vm1, %v1372_v13, %v1368_v61 }
  0xe4   :  { %645 = vbcast.lane.b32.xlu0 %v3366_v0, 272  ;;  %v3426_v59 = vpop.xlane.xlu1 %1323  ;;  %v3428_v62 = vpop.xlane.xlu0 %1320  ;;  %v1420_v24 = vsel %vm187_vm3, %v1373_v21, %v1419_v22 }
  0xe5   :  { %v1408_v45 = vrot.slane %v3426_v59, %v3318_v12  ;;  %v1404_v46 = vrot.slane %v3428_v62, %v3322_v15 }
  0xe7   :  { %1054 = vadd.xlane.f32.xlu1 %v1053_v55  ;;  %v1400_v55 = vsel %vm120_vm1, %v1399_v42, %v1395_v43  ;;  %v1409_v59 = vsel %vm120_vm1, %v1408_v45, %v1404_v46  ;;  %v39_v43 = vld [vmem:[%s4282_s2 + $0x58] sm:$0xff]  ;;  %v60_v45 = vsel %vm44_vm0, %v33_v50, 0.0  ;;  %v41_v46 = vld [vmem:[%s4282_s2 + $0x68] sm:$0xff] }
  0xe8   :  { %766 = vbcast.lane.b32.xlu0 %v3414_v53, 272  ;;  %v1306_v2 = vpop.xlane.xlu1 %1305  ;;  %v1303_v3 = vpop.xlane.xlu0 %1302 }
  0xe9   :  { %v1381_v17 = vrot.slane %v1306_v2, %v3318_v12  ;;  %v1377_v18 = vrot.slane %v1303_v3, %v3322_v15  ;;  %v32_v2 = vld [vmem:[%s4282_s2 + $0x20] sm:$0xff]  ;;  %v1422_v3 = vsel %vm185_vm2, %v1400_v55, %v1391_v51 }
  0xea   :  { %v57_v5 = vsel %vm44_vm0, %v32_v2, 0.0 }
  0xeb   :  { %v1382_v23 = vsel %vm120_vm1, %v1381_v17, %v1377_v18 }
  0xec   :  { %825 = vbcast.lane.b32.xlu0 %v3423_v56, 272  ;;  %v1330_v9 = vpop.xlane.xlu1 %1329  ;;  %v1327_v10 = vpop.xlane.xlu0 %1326  ;;  %v1421_v25 = vsel %vm189_vm4, %v1382_v23, %v1420_v24 }
  0xed   :  { %v1427_v29 = vsel %vm196_vm5, %v1421_v25, 0.0  ;;  %v1417_v57 = vrot.slane %v1330_v9, %v3318_v12  ;;  %v1413_v58 = vrot.slane %v1327_v10, %v3322_v15  ;;  %v1423_v9 = vsel %vm187_vm3, %v1409_v59, %v1422_v3  ;;  %v31_v25 = vld [vmem:[%s4282_s2 + $0x18] sm:$0xff] }
  0xef   :  { %v1418_v8 = vsel %vm120_vm1, %v1417_v57, %v1413_v58  ;;  %v84_v58 = vsel %vm44_vm0, %v41_v46, 0.0 }
  0xf0   :  { %v3450_v19 = vpop.xlane.xlu1 %1664  ;;  %v3452_v20 = vpop.xlane.xlu0 %1661  ;;  %v1424_v17 = vsel %vm189_vm4, %v1418_v8, %v1423_v9 }
  0xf1   :  { %v1731_v10 = vrot.slane %v3450_v19, %v3318_v12  ;;  %v1727_v13 = vrot.slane %v3452_v20, %v3322_v15  ;;  %v34_v19 = vld [vmem:[%s4282_s2 + $0x30] sm:$0xff] }
  0xf3   :  { %v1732_v20 = vsel %vm120_vm1, %v1731_v10, %v1727_v13 }
  0xf4   :  { %v1671_v26 = vpop.xlane.xlu1 %1670  ;;  %v1668_v27 = vpop.xlane.xlu0 %1667 }
  0xf5   :  { %v1740_v61 = vrot.slane %v1671_v26, %v3318_v12  ;;  %v1736_v14 = vrot.slane %v1668_v27, %v3322_v15  ;;  %v1430_v26 = vsel %vm196_vm5, %v1424_v17, 0.0  ;;  %v3013_v17 = vmov 0  }
  0xf6   :  { %2888 = vset.pattern.permute.xlu1 %v3013_v17  ;;  %2889 = vset.pattern.permute.xlu0 %v3013_v17 }
  0xf7   :  { %v1741_v24 = vsel %vm120_vm1, %v1740_v61, %v1736_v14  ;;  %2071 = vmatprep.mubr.bf16.mxu0 %v3013_v17 }
  0xf8   :  { %707 = vbcast.lane.b32.xlu1 %v3435_v1, 272  ;;  %v3465_v31 = vpop.xlane.xlu1 %1688  ;;  %v3467_v32 = vpop.xlane.xlu0 %1685  ;;  %v1796_v35 = vsel %vm185_vm2, %v1741_v24, %v1732_v20 }
  0xf9   :  { %v1767_v51 = vrot.slane %v3465_v31, %v3318_v12  ;;  %v1763_v55 = vrot.slane %v3467_v32, %v3322_v15  ;;  %v35_v32 = vld [vmem:[%s4282_s2 + $0x38] sm:$0xff] }
  0xfc   :  { %711 = vbcast.lane.b32.xlu1 %v3435_v1, 280  ;;  %v3476_v36 = vpop.xlane.xlu1 %1694  ;;  %v3478_v37 = vpop.xlane.xlu0 %1691 }
  0xfd   :  { %v1772_v57 = vrot.slane %v3478_v37, %v3322_v15 }
 0x100   :  { %770 = vbcast.lane.b32.xlu1 %v3414_v53, 280  ;;  %v1677_v47 = vpop.xlane.xlu1 %1676  ;;  %v1674_v48 = vpop.xlane.xlu0 %1673 }
 0x101   :  { %v1749_v18 = vrot.slane %v1677_v47, %v3318_v12  ;;  %v1745_v21 = vrot.slane %v1674_v48, %v3322_v15  ;;  %v78_v47 = vsel %vm44_vm0, %v39_v43, 0.0 }
 0x104   :  { %829 = vbcast.lane.b32.xlu1 %v3423_v56, 280  ;;  %v3510_v62 = vpop.xlane.xlu1 %1700  ;;  %v3512_v4 = vpop.xlane.xlu0 %1697 }
 0x105   :  { %v1785_v2 = vrot.slane %v3510_v62, %v3318_v12  ;;  %v1781_v59 = vrot.slane %v3512_v4, %v3322_v15  ;;  %v66_v62 = vsel %vm44_vm0, %v35_v32, 0.0  ;;  %v43_v4 = vld [vmem:[%s4282_s2 + $0x78] sm:$0xff] }
 0x106   :  { %v90_v10 = vsel %vm44_vm0, %v43_v4, 0.0 }
 0x107   :  { %v1786_v8 = vsel %vm120_vm1, %v1785_v2, %v1781_v59 }
 0x108   :  { %v1683_v22 = vpop.xlane.xlu1 %1682  ;;  %v1680_v23 = vpop.xlane.xlu0 %1679 }
 0x109   :  { %v1758_v27 = vrot.slane %v1683_v22, %v3318_v12  ;;  %v1754_v28 = vrot.slane %v1680_v23, %v3322_v15 }
 0x10b   :  { %1428 = vadd.xlane.f32.xlu0 %v1427_v29  ;;  %v63_v29 = vsel %vm44_vm0, %v34_v19, 0.0  ;;  %v1759_v40 = vsel %vm120_vm1, %v1758_v27, %v1754_v28 }
 0x10c   :  { %v1707_v3 = vpop.xlane.xlu1 %1706  ;;  %v1704_v31 = vpop.xlane.xlu0 %1703 }
 0x10d   :  { %v1794_v37 = vrot.slane %v1707_v3, %v3318_v12  ;;  %v1790_v6 = vrot.slane %v1704_v31, %v3322_v15 }
 0x10f   :  { %46 = vadd.xlane.f32.xlu0 %v45_v30  ;;  %v54_v30 = vsel %vm44_vm0, %v31_v25, 0.0  ;;  %v1795_v13 = vsel %vm120_vm1, %v1794_v37, %v1790_v6 }
 0x113   :  { %49 = vadd.xlane.f32.xlu0 %v48_v34  ;;  %v1750_v34 = vsel %vm120_vm1, %v1749_v18, %v1745_v21 }
 0x114   :  { %v1797_v41 = vsel %vm187_vm3, %v1750_v34, %v1796_v35 }
 0x117   :  { %52 = vadd.xlane.f32.xlu0 %v51_v38  ;;  %v37_v38 = vld [vmem:[%s4282_s2 + $0x48] sm:$0xff] }
 0x118   :  { %v72_v42 = vsel %vm44_vm0, %v37_v38, 0.0 }
 0x11b   :  { %70 = vadd.xlane.f32.xlu0 %v69_v44  ;;  %v1798_v44 = vsel %vm189_vm4, %v1759_v40, %v1797_v41 }
 0x11c   :  { %v1804_v48 = vsel %vm196_vm5, %v1798_v44, 0.0 }
 0x11f   :  { %76 = vadd.xlane.f32.xlu0 %v75_v52  ;;  %v1776_v52 = vrot.slane %v3476_v36, %v3318_v12  ;;  %v1768_v36 = vsel %vm120_vm1, %v1767_v51, %v1763_v55 }
 0x123   :  { %58 = vadd.xlane.f32.xlu0 %v57_v5  ;;  %v1777_v5 = vsel %vm120_vm1, %v1776_v52, %v1772_v57 }
 0x124   :  { %v1799_v9 = vsel %vm185_vm2, %v1777_v5, %v1768_v36 }
 0x125   :  { %v1800_v61 = vsel %vm187_vm3, %v1786_v8, %v1799_v9 }
 0x126   :  { %v1801_v14 = vsel %vm189_vm4, %v1795_v13, %v1800_v61 }
 0x127   :  { %82 = vadd.xlane.f32.xlu0 %v81_v16  ;;  %v1807_v16 = vsel %vm196_vm5, %v1801_v14, 0.0 }
 0x128   :  { %1431 = vadd.xlane.f32.xlu1 %v1430_v26 }
 0x12b   :  { %64 = vadd.xlane.f32.xlu0 %v63_v29 }
 0x12c   :  { %55 = vadd.xlane.f32.xlu1 %v54_v30 }
 0x12f   :  { %88 = vadd.xlane.f32.xlu0 %v87_v39 }
 0x130   :  { %73 = vadd.xlane.f32.xlu1 %v72_v42 }
 0x133   :  { %1805 = vadd.xlane.f32.xlu0 %v1804_v48 }
 0x134   :  { %79 = vadd.xlane.f32.xlu1 %v78_v47 }
 0x138   :  { %61 = vadd.xlane.f32.xlu1 %v60_v45 }
 0x13b   :  { %v3602_v18 = vpop.xlane.xlu0 %630 }
 0x13c   :  { %85 = vadd.xlane.f32.xlu1 %v84_v58 }
 0x13f   :  { %v3608_v23 = vpop.xlane.xlu1 %633 }
 0x140   :  { %67 = vadd.xlane.f32.xlu1 %v66_v62 }
 0x143   :  { %v3612_v20 = vpop.permute.xlu1 %649 }
 0x144   :  { %91 = vadd.xlane.f32.xlu1 %v90_v10 }
 0x148   :  { %1808 = vadd.xlane.f32.xlu1 %v1807_v16 }
 0x15b   :  { %v3604_v21 = vpop.xlane.xlu0 %1051 }
 0x15f   :  { %v3606_v22 = vpop.permute.xlu0 %645 }
 0x163   :  { %v3610_v19 = vpop.permute.xlu0 %766 }
 0x167   :  { %v3614_v24 = vpop.permute.xlu0 %825 }
 0x174   :  { %v3616_v25 = vpop.xlane.xlu1 %1054 }
 0x178   :  { %v3620_v27 = vpop.permute.xlu1 %707 }
 0x17c   :  { %v3622_v29 = vpop.permute.xlu1 %711 }
 0x180   :  { %v3624_v33 = vpop.permute.xlu1 %770 }
 0x184   :  { %v3626_v35 = vpop.permute.xlu1 %829 }
 0x198   :  { %v3618_v26 = vpop.xlane.xlu0 %1428 }
 0x19c   :  { %v47_v28 = vpop.xlane.xlu0 %46 }
 0x19d   :  { %v114_v57 = vrot.slane %v47_v28, %v3322_v15 }
 0x1a0   :  { %v50_v30 = vpop.xlane.xlu0 %49 }
 0x1a1   :  { %v119_v58 = vrot.slane %v50_v30, %v3318_v12 }
 0x1a3   :  { %v121_v6 = vsel %vm120_vm1, %v119_v58, %v114_v57  ;;  %v759_v58 = vrot.slane %v3602_v18, %v3404_v49 }
 0x1a4   :  { %v53_v34 = vpop.xlane.xlu0 %52 }
 0x1a5   :  { %v125_v50 = vrot.slane %v53_v34, %v3322_v15 }
 0x1a8   :  { %v71_v38 = vpop.xlane.xlu0 %70 }
 0x1a9   :  { %v152_v62 = vrot.slane %v71_v38, %v3322_v15 }
 0x1ac   :  { %v77_v40 = vpop.xlane.xlu0 %76 }
 0x1ad   :  { %v161_v2 = vrot.slane %v77_v40, %v3322_v15 }
 0x1b0   :  { %v59_v42 = vpop.xlane.xlu0 %58 }
 0x1b1   :  { %v134_v46 = vrot.slane %v59_v42, %v3322_v15 }
 0x1b4   :  { %v83_v47 = vpop.xlane.xlu0 %82 }
 0x1b5   :  { %v3628_v39 = vpop.xlane.xlu1 %1431  ;;  %v170_v32 = vrot.slane %v83_v47, %v3322_v15 }
 0x1b8   :  { %v65_v51 = vpop.xlane.xlu0 %64 }
 0x1b9   :  { %v56_v41 = vpop.xlane.xlu1 %55  ;;  %v143_v59 = vrot.slane %v65_v51, %v3322_v15 }
 0x1ba   :  { %v129_v45 = vrot.slane %v56_v41, %v3318_v12 }
 0x1bc   :  { %v130_v3 = vsel %vm120_vm1, %v129_v45, %v125_v50  ;;  %v89_v9 = vpop.xlane.xlu0 %88  ;;  %v638_v50 = vrot.slane %v3602_v18, %v3357_v60 }
 0x1bd   :  { %v74_v43 = vpop.xlane.xlu1 %73  ;;  %v186_v10 = vsel %vm185_vm2, %v130_v3, %v121_v6  ;;  %v179_v13 = vrot.slane %v89_v9, %v3322_v15  ;;  %v763_v3 = vrot.slane %v3608_v23, %v3404_v49 }
 0x1be   :  { %v156_v4 = vrot.slane %v74_v43, %v3318_v12  ;;  %v654_v45 = vmul.f32 %v3612_v20, %v638_v50  ;;  %v653_v57 = vmul.f32 %v3606_v22, %v638_v50 }
 0x1c0   :  { %v157_v38 = vsel %vm120_vm1, %v156_v4, %v152_v62  ;;  %v822_v62 = vrot.slane %v3608_v23, %v3417_v54 }
 0x1c1   :  { %v80_v44 = vpop.xlane.xlu1 %79 }
 0x1c2   :  { %v165_v31 = vrot.slane %v80_v44, %v3318_v12  ;;  %v836_v9 = vmul.f32 %v3626_v35, %v822_v62 }
 0x1c4   :  { %v166_v61 = vsel %vm120_vm1, %v165_v31, %v161_v2 }
 0x1c5   :  { %v62_v48 = vpop.xlane.xlu1 %61  ;;  %v191_v42 = vsel %vm185_vm2, %v166_v61, %v157_v38 }
 0x1c6   :  { %v138_v55 = vrot.slane %v62_v48, %v3318_v12 }
 0x1c8   :  { %v139_v37 = vsel %vm120_vm1, %v138_v55, %v134_v46  ;;  %v642_v46 = vrot.slane %v3608_v23, %v3357_v60 }
 0x1c9   :  { %v86_v52 = vpop.xlane.xlu1 %85  ;;  %v188_v16 = vsel %vm187_vm3, %v139_v37, %v186_v10  ;;  %v1063_v10 = vrot.slane %v3616_v25, %v3357_v60 }
 0x1ca   :  { %v174_v36 = vrot.slane %v86_v52, %v3318_v12  ;;  %v655_v51 = vmul.f32 %v3606_v22, %v642_v46  ;;  %v656_v55 = vmul.f32 %v3612_v20, %v642_v46  ;;  %v700_v52 = vrot.slane %v3602_v18, %v3431_v63 }
 0x1cb   :  { %v1067_v61 = vmul.f32 %v1063_v10, %v3612_v20  ;;  %v1210_v46 = vrot.slane %v3616_v25, %v3417_v54 }
 0x1cc   :  { %v175_v34 = vsel %vm120_vm1, %v174_v36, %v170_v32  ;;  %v715_v2 = vmul.f32 %v3620_v27, %v700_v52  ;;  %v716_v31 = vmul.f32 %v3622_v29, %v700_v52  ;;  %v704_v32 = vrot.slane %v3608_v23, %v3431_v63 }
 0x1cd   :  { %v68_v5 = vpop.xlane.xlu1 %67  ;;  %v192_v44 = vsel %vm187_vm3, %v175_v34, %v191_v42  ;;  %v777_v36 = vmul.f32 %v3624_v33, %v763_v3  ;;  %v776_v23 = vmul.f32 %v3610_v19, %v763_v3  ;;  %v835_v34 = vmul.f32 %v3614_v24, %v822_v62 }
 0x1ce   :  { %v147_v8 = vrot.slane %v68_v5, %v3318_v12  ;;  %v818_v5 = vrot.slane %v3602_v18, %v3417_v54  ;;  %v717_v37 = vmul.f32 %v3620_v27, %v704_v32  ;;  %v718_v4 = vmul.f32 %v3622_v29, %v704_v32 }
 0x1cf   :  { %v774_v18 = vmul.f32 %v3610_v19, %v759_v58  ;;  %v1214_v52 = vmul.f32 %v1210_v46, %v3626_v35  ;;  %v1538_v62 = vrot.slane %v3628_v39, %v3404_v49 }
 0x1d0   :  { %v148_v14 = vsel %vm120_vm1, %v147_v8, %v143_v59  ;;  %v775_v59 = vmul.f32 %v3624_v33, %v759_v58  ;;  %v834_v6 = vmul.f32 %v3626_v35, %v818_v5  ;;  %v1059_v8 = vrot.slane %v3604_v21, %v3357_v60 }
 0x1d1   :  { %v92_v28 = vpop.xlane.xlu1 %91  ;;  %v190_v30 = vsel %vm189_vm4, %v148_v14, %v188_v16  ;;  %v1108_v14 = vrot.slane %v3604_v21, %v3431_v63  ;;  %v833_v16 = vmul.f32 %v3614_v24, %v818_v5  ;;  %v1534_v5 = vrot.slane %v3618_v26, %v3404_v49 }
 0x1d2   :  { %v183_v40 = vrot.slane %v92_v28, %v3318_v12  ;;  %v197_v41 = vsel %vm196_vm5, %v190_v30, 0.0  ;;  %v1112_v30 = vrot.slane %v3616_v25, %v3431_v63 }
 0x1d3   :  { %198 = vadd.xlane.f32.xlu1 %v197_v41  ;;  %v1114_v28 = vmul.f32 %v1108_v14, %v3622_v29  ;;  %v1064_v41 = vmul.f32 %v1059_v8, %v3606_v22  ;;  %v1113_v50 = vmul.f32 %v1108_v14, %v3620_v27 }
 0x1d4   :  { %v184_v43 = vsel %vm120_vm1, %v183_v40, %v179_v13  ;;  %v1065_v13 = vmul.f32 %v1059_v8, %v3612_v20  ;;  %v1116_v38 = vmul.f32 %v1112_v30, %v3622_v29  ;;  %v1157_v40 = vrot.slane %v3604_v21, %v3404_v49 }
 0x1d5   :  { %v193_v47 = vsel %vm189_vm4, %v184_v43, %v192_v44  ;;  %v1161_v43 = vrot.slane %v3616_v25, %v3404_v49  ;;  %v1066_v44 = vmul.f32 %v1063_v10, %v3606_v22 }
 0x1d6   :  { %v200_v48 = vsel %vm196_vm5, %v193_v47, 0.0  ;;  %v1163_v42 = vmul.f32 %v1157_v40, %v3624_v33 }
 0x1d7   :  { %201 = vadd.xlane.f32.xlu0 %v200_v48  ;;  %v1165_v47 = vmul.f32 %v1161_v43, %v3624_v33  ;;  %v1206_v48 = vrot.slane %v3604_v21, %v3417_v54  ;;  %v1162_v21 = vmul.f32 %v1157_v40, %v3610_v19  ;;  %v1164_v25 = vmul.f32 %v1161_v43, %v3610_v19 }
 0x1d9   :  { %v1211_v3 = vmul.f32 %v1206_v48, %v3614_v24 }
 0x1e4   :  { %665 = vperm.xlu1 %2888, %v654_v45   ;;  %v1212_v45 = vmul.f32 %v1206_v48, %v3626_v35 }
 0x1e8   :  { %668 = vperm.xlu1 %2888, %v655_v51   ;;  %v1115_v51 = vmul.f32 %v1112_v30, %v3620_v27 }
 0x1ec   :  { %671 = vperm.xlu1 %2888, %v656_v55   ;;  %v1436_v55 = vrot.slane %v3618_v26, %v3357_v60 }
 0x1ed   :  { %662 = vperm.xlu0 %2889, %v653_v57   ;;  %v1440_v57 = vrot.slane %v3628_v39, %v3357_v60 }
 0x1ee   :  { %v1442_v58 = vmul.f32 %v1436_v55, %v3612_v20 }
 0x1ef   :  { %v1443_v8 = vmul.f32 %v1440_v57, %v3606_v22 }
 0x1f0   :  { %724 = vperm.xlu1 %2888, %v715_v2   ;;  %v1485_v2 = vrot.slane %v3618_v26, %v3431_v63 }
 0x1f1   :  { %786 = vperm.xlu0 %2889, %v775_v59   ;;  %v1444_v59 = vmul.f32 %v1440_v57, %v3612_v20 }
 0x1f2   :  { %v1491_v32 = vmul.f32 %v1485_v2, %v3622_v29  ;;  %v1490_v10 = vmul.f32 %v1485_v2, %v3620_v27 }
 0x1f4   :  { %727 = vperm.xlu1 %2888, %v716_v31   ;;  %v1489_v31 = vrot.slane %v3628_v39, %v3431_v63 }
 0x1f5   :  { %792 = vperm.xlu0 %2889, %v777_v36   ;;  %v1213_v36 = vmul.f32 %v1210_v46, %v3614_v24 }
 0x1f8   :  { %730 = vperm.xlu1 %2888, %v717_v37   ;;  %v1493_v37 = vmul.f32 %v1489_v31, %v3622_v29 }
 0x1f9   :  { %845 = vperm.xlu0 %2889, %v834_v6   ;;  %v1441_v6 = vmul.f32 %v1436_v55, %v3606_v22 }
 0x1fc   :  { %733 = vperm.xlu1 %2888, %v718_v4   ;;  %v1539_v4 = vmul.f32 %v1534_v5, %v3610_v19 }
 0x1fd   :  { %851 = vperm.xlu0 %2889, %v836_v9   ;;  %v1583_v9 = vrot.slane %v3618_v26, %v3417_v54  ;;  %v1540_v26 = vmul.f32 %v1534_v5, %v3624_v33 }
 0x200   :  { %783 = vperm.xlu1 %2888, %v774_v18   ;;  %v1542_v18 = vmul.f32 %v1538_v62, %v3624_v33 }
 0x201   :  { %1076 = vperm.xlu0 %2889, %v1065_v13   ;;  %v1587_v13 = vrot.slane %v3628_v39, %v3417_v54  ;;  %v1588_v39 = vmul.f32 %v1583_v9, %v3614_v24 }
 0x203   :  { %v1591_v14 = vmul.f32 %v1587_v13, %v3626_v35 }
 0x204   :  { %789 = vperm.xlu1 %2888, %v776_v23   ;;  %v1589_v23 = vmul.f32 %v1583_v9, %v3626_v35 }
 0x205   :  { %1082 = vperm.xlu0 %2889, %v1067_v61   ;;  %v1492_v61 = vmul.f32 %v1489_v31, %v3620_v27 }
 0x208   :  { %842 = vperm.xlu1 %2888, %v833_v16   ;;  %v1541_v16 = vmul.f32 %v1538_v62, %v3610_v19 }
 0x209   :  { %1125 = vperm.xlu0 %2889, %v1114_v28   ;;  %v1806_v28 = vpop.xlane.xlu0 %1805 }
 0x20a   :  { %v3760_v30 = vrot.slane %v1806_v28, %v3357_v60  ;;  %v3781_v48 = vrot.slane %v1806_v28, %v3404_v49 }
 0x20c   :  { %848 = vperm.xlu1 %2888, %v835_v34   ;;  %v1590_v34 = vmul.f32 %v1587_v13, %v3614_v24 }
 0x20d   :  { %1131 = vperm.xlu0 %2889, %v1116_v38   ;;  %v1809_v38 = vpop.xlane.xlu1 %1808 }
 0x20e   :  { %v3765_v40 = vrot.slane %v1809_v38, %v3357_v60 }
 0x210   :  { %1073 = vperm.xlu1 %2888, %v1064_v41   ;;  %v1818_v41 = vmul.f32 %v3760_v30, %v3606_v22  ;;  %v1820_v43 = vmul.f32 %v3765_v40, %v3606_v22  ;;  %v1916_v22 = vmul.f32 %v3781_v48, %v3610_v19 }
 0x211   :  { %1174 = vperm.xlu0 %2889, %v1163_v42   ;;  %v3771_v42 = vrot.slane %v1806_v28, %v3431_v63 }
 0x214   :  { %1079 = vperm.xlu1 %2888, %v1066_v44   ;;  %v3776_v44 = vrot.slane %v1809_v38, %v3431_v63 }
 0x215   :  { %1180 = vperm.xlu0 %2889, %v1165_v47   ;;  %v1867_v47 = vmul.f32 %v3771_v42, %v3620_v27 }
 0x218   :  { %1122 = vperm.xlu1 %2888, %v1113_v50   ;;  %v1869_v50 = vmul.f32 %v3776_v44, %v3620_v27  ;;  %v3798_v27 = vrot.slane %v1809_v38, %v3417_v54 }
 0x219   :  { %1223 = vperm.xlu0 %2889, %v1212_v45   ;;  %v3786_v45 = vrot.slane %v1809_v38, %v3404_v49 }
 0x21b   :  { %v1918_v55 = vmul.f32 %v3786_v45, %v3610_v19 }
 0x21c   :  { %1128 = vperm.xlu1 %2888, %v1115_v51   ;;  %v3793_v51 = vrot.slane %v1806_v28, %v3417_v54 }
 0x21d   :  { %1229 = vperm.xlu0 %2889, %v1214_v52  }
 0x220   :  { %1171 = vperm.xlu1 %2888, %v1162_v21   ;;  %v1965_v21 = vmul.f32 %v3793_v51, %v3614_v24 }
 0x221   :  { %1453 = vperm.xlu0 %2889, %v1442_v58  }
 0x224   :  { %1177 = vperm.xlu1 %2888, %v1164_v25   ;;  %v1967_v25 = vmul.f32 %v3798_v27, %v3614_v24 }
 0x225   :  { %1459 = vperm.xlu0 %2889, %v1444_v59  }
 0x228   :  { %1220 = vperm.xlu1 %2888, %v1211_v3  }
 0x229   :  { %1502 = vperm.xlu0 %2889, %v1491_v32  }
 0x22c   :  { %1226 = vperm.xlu1 %2888, %v1213_v36  }
 0x22d   :  { %1508 = vperm.xlu0 %2889, %v1493_v37  }
 0x230   :  { %1450 = vperm.xlu1 %2888, %v1441_v6  }
 0x231   :  { %1548 = vperm.xlu0 %2889, %v1539_v4   ;;  %v678_v4 = vadd.s32 4294967272, %v3312_v7 }
 0x234   :  { %1456 = vperm.xlu1 %2888, %v1443_v8  }
 0x235   :  { %1557 = vperm.xlu0 %2889, %v1542_v18  }
 0x238   :  { %1499 = vperm.xlu1 %2888, %v1490_v10  }
 0x239   :  { %1600 = vperm.xlu0 %2889, %v1589_v23  }
 0x23c   :  { %1505 = vperm.xlu1 %2888, %v1492_v61  }
 0x23d   :  { %1606 = vperm.xlu0 %2889, %v1591_v14  }
 0x240   :  { %1551 = vperm.xlu1 %2888, %v1540_v26  }
 0x241   :  { %223 = vbcast.lane.b32.xlu0 %v3366_v0, 264 }
 0x244   :  { %1554 = vperm.xlu1 %2888, %v1541_v16  }
 0x245   :  { %286 = vbcast.lane.b32.xlu0 %v3435_v1, 264 }
 0x248   :  { %1597 = vperm.xlu1 %2888, %v1588_v39  }
 0x249   :  { %349 = vbcast.lane.b32.xlu0 %v3414_v53, 264 }
 0x24c   :  { %1603 = vperm.xlu1 %2888, %v1590_v34  }
 0x24d   :  { %412 = vbcast.lane.b32.xlu0 %v3423_v56, 264 }
 0x250   :  { %1827 = vperm.xlu1 %2888, %v1818_v41  }
 0x254   :  { %1833 = vperm.xlu1 %2888, %v1820_v43  }
 0x258   :  { %1876 = vperm.xlu1 %2888, %v1867_v47  }
 0x25c   :  { %1882 = vperm.xlu1 %2888, %v1869_v50  }
 0x260   :  { %v3790_v46 = vpop.xlane.xlu1 %198  ;;  %1925 = vperm.xlu1 %2888, %v1916_v22  }
 0x264   :  { %v666_v52 = vpop.permute.xlu1 %665  ;;  %1931 = vperm.xlu1 %2888, %v1918_v55   ;;  %v3802_v58 = vpop.xlane.xlu0 %201 }
 0x268   :  { %v669_v57 = vpop.permute.xlu1 %668  ;;  %1974 = vperm.xlu1 %2888, %v1965_v21  }
 0x26c   :  { %v672_v2 = vpop.permute.xlu1 %671  ;;  %1980 = vperm.xlu1 %2888, %v1967_v25   ;;  %v663_v59 = vpop.permute.xlu0 %662 }
 0x270   :  { %v725_v3 = vpop.permute.xlu1 %724  ;;  %219 = vbcast.lane.b32.xlu1 %v3366_v0, 256  ;;  %v787_v19 = vpop.permute.xlu0 %786  ;;  %v673_v0 = vadd.s32 4294967280, %v3312_v7 }
 0x274   :  { %v728_v31 = vpop.permute.xlu1 %727  ;;  %282 = vbcast.lane.b32.xlu1 %v3435_v1, 256  ;;  %v793_v32 = vpop.permute.xlu0 %792  ;;  %v3817_v1 = vsub.s32 %v678_v4, %v3315_v11 }
 0x276   :  { %v682_v61 = vrot.slane %v666_v52, %v3817_v1  ;;  %v742_v39 = vrot.slane %v728_v31, %v3817_v1  ;;  %v810_v43 = vrot.slane %v793_v32, %v3817_v1  ;;  %v3842_v52 = vld [vmem:[%s4281_s1 + $0x4] ss:$0 sm:$0xff] }
 0x278   :  { %v731_v36 = vpop.permute.xlu1 %730  ;;  %345 = vbcast.lane.b32.xlu1 %v3414_v53, 256  ;;  %v846_v5 = vpop.permute.xlu0 %845  ;;  %v3820_v53 = vsub.s32 %v673_v0, %v3315_v11 }
 0x27a   :  { %v677_v13 = vrot.slane %v663_v59, %v3820_v53  ;;  %v688_v23 = vrot.slane %v669_v57, %v3820_v53  ;;  %v747_v28 = vrot.slane %v731_v36, %v3820_v53  ;;  %v738_v38 = vrot.slane %v725_v3, %v3820_v53 }
 0x27b   :  { %v801_v57 = vrot.slane %v787_v19, %v3817_v1 }
 0x27c   :  { %v734_v37 = vpop.permute.xlu1 %733  ;;  %408 = vbcast.lane.b32.xlu1 %v3423_v56, 256  ;;  %v852_v6 = vpop.permute.xlu0 %851  ;;  %v692_v56 = vrot.slane %v672_v2, %v3817_v1  ;;  %v684_v11 = vsel %vm683_vm6, %v682_v61, %v677_v13  ;;  %v743_v25 = vsel %vm683_vm6, %v742_v39, %v738_v38 }
 0x27d   :  { %v751_v14 = vrot.slane %v734_v37, %v3817_v1  ;;  %v869_v2 = vrot.slane %v852_v6, %v3817_v1  ;;  %v860_v37 = vrot.slane %v846_v5, %v3817_v1 }
 0x27e   :  { %v693_v16 = vsel %vm683_vm6, %v692_v56, %v688_v23 }
 0x27f   :  { %v752_v47 = vsel %vm683_vm6, %v751_v14, %v747_v28  ;;  %v694_v21 = vsel %vm185_vm2, %v693_v16, %v684_v11 }
 0x280   :  { %v784_v24 = vpop.permute.xlu1 %783  ;;  %v3810_v62 = vpop.permute.xlu0 %1076  ;;  %v753_v31 = vsel %vm185_vm2, %v752_v47, %v743_v25  ;;  %v696_v36 = vadd.f32 %v694_v21, %v3842_v52 }
 0x281   :  { %v797_v50 = vrot.slane %v784_v24, %v3820_v53 }
 0x283   :  { %v802_v24 = vsel %vm683_vm6, %v801_v57, %v797_v50 }
 0x284   :  { %v790_v8 = vpop.permute.xlu1 %789  ;;  %v3814_v9 = vpop.permute.xlu0 %1082 }
 0x285   :  { %v806_v34 = vrot.slane %v790_v8, %v3820_v53  ;;  %v755_v8 = vadd.f32 %v753_v31, %v696_v36  ;;  %v1100_v28 = vrot.slane %v3814_v9, %v3817_v1 }
 0x287   :  { %v811_v59 = vsel %vm683_vm6, %v810_v43, %v806_v34  ;;  %v1091_v43 = vrot.slane %v3810_v62, %v3817_v1 }
 0x288   :  { %v843_v18 = vpop.permute.xlu1 %842  ;;  %v3822_v10 = vpop.permute.xlu0 %1125  ;;  %v812_v0 = vsel %vm185_vm2, %v811_v59, %v802_v24 }
 0x289   :  { %v856_v3 = vrot.slane %v843_v18, %v3820_v53  ;;  %v814_v23 = vadd.f32 %v812_v0, %v755_v8  ;;  %v1140_v25 = vrot.slane %v3822_v10, %v3817_v1 }
 0x28b   :  { %v861_v6 = vsel %vm683_vm6, %v860_v37, %v856_v3 }
 0x28c   :  { %v849_v7 = vpop.permute.xlu1 %848  ;;  %v1132_v26 = vpop.permute.xlu0 %1131 }
 0x28d   :  { %v865_v22 = vrot.slane %v849_v7, %v3820_v53  ;;  %v1149_v50 = vrot.slane %v1132_v26, %v3817_v1 }
 0x28f   :  { %v870_v4 = vsel %vm683_vm6, %v869_v2, %v865_v22 }
 0x290   :  { %v1074_v41 = vpop.permute.xlu1 %1073  ;;  %v1175_v55 = vpop.permute.xlu0 %1174  ;;  %v871_v18 = vsel %vm185_vm2, %v870_v4, %v861_v6 }
 0x291   :  { %v3858_v7 = vadd.f32 %v871_v18, %v814_v23  ;;  %v1087_v34 = vrot.slane %v1074_v41, %v3820_v53  ;;  %v1189_v31 = vrot.slane %v1175_v55, %v3817_v1 }
 0x293   :  { %v875_v14 = vsel %vm874_vm7, %v3858_v7, -inf  ;;  %v1092_v41 = vsel %vm683_vm6, %v1091_v43, %v1087_v34 }
 0x294   :  { %v1080_v32 = vpop.permute.xlu1 %1079  ;;  %v1181_v19 = vpop.permute.xlu0 %1180 }
 0x295   :  { %v1096_v11 = vrot.slane %v1080_v32, %v3820_v53  ;;  %v1198_v2 = vrot.slane %v1181_v19, %v3817_v1 }
 0x297   :  { %v1101_v22 = vsel %vm683_vm6, %v1100_v28, %v1096_v11 }
 0x298   :  { %v1123_v56 = vpop.permute.xlu1 %1122  ;;  %v1224_v13 = vpop.permute.xlu0 %1223  ;;  %v1102_v26 = vsel %vm185_vm2, %v1101_v22, %v1092_v41 }
 0x299   :  { %v1136_v21 = vrot.slane %v1123_v56, %v3820_v53  ;;  %v1104_v37 = vadd.f32 %v1102_v26, %v3842_v52  ;;  %v1238_v8 = vrot.slane %v1224_v13, %v3817_v1 }
 0x29b   :  { %v1141_v32 = vsel %vm683_vm6, %v1140_v25, %v1136_v21 }
 0x29c   :  { %v1129_v61 = vpop.permute.xlu1 %1128  ;;  %v1230_v5 = vpop.permute.xlu0 %1229 }
 0x29d   :  { %v1145_v38 = vrot.slane %v1129_v61, %v3820_v53  ;;  %v1247_v55 = vrot.slane %v1230_v5, %v3817_v1 }
 0x29f   :  { %v1150_v59 = vsel %vm683_vm6, %v1149_v50, %v1145_v38 }
 0x2a0   :  { %v1172_v16 = vpop.permute.xlu1 %1171  ;;  %876 = vmax.xlane.f32.xlu1 %v875_v14  ;;  %v1454_v39 = vpop.permute.xlu0 %1453  ;;  %v1151_v10 = vsel %vm185_vm2, %v1150_v59, %v1141_v32 }
 0x2a1   :  { %v1185_v62 = vrot.slane %v1172_v16, %v3820_v53  ;;  %v1153_v18 = vadd.f32 %v1151_v10, %v1104_v37 }
 0x2a3   :  { %v1190_v24 = vsel %vm683_vm6, %v1189_v31, %v1185_v62 }
 0x2a4   :  { %v1178_v47 = vpop.permute.xlu1 %1177  ;;  %v1460_v9 = vpop.permute.xlu0 %1459 }
 0x2a5   :  { %v1194_v57 = vrot.slane %v1178_v47, %v3820_v53 }
 0x2a7   :  { %v1199_v36 = vsel %vm683_vm6, %v1198_v2, %v1194_v57  ;;  %v1477_v57 = vrot.slane %v1460_v9, %v3817_v1  ;;  %v1468_v2 = vrot.slane %v1454_v39, %v3817_v1 }
 0x2a8   :  { %v1221_v3 = vpop.permute.xlu1 %1220  ;;  %v1503_v19 = vpop.permute.xlu0 %1502  ;;  %v1200_v6 = vsel %vm185_vm2, %v1199_v36, %v1190_v24 }
 0x2a9   :  { %v1234_v4 = vrot.slane %v1221_v3, %v3820_v53  ;;  %v1202_v14 = vadd.f32 %v1200_v6, %v1153_v18  ;;  %v1517_v36 = vrot.slane %v1503_v19, %v3817_v1 }
 0x2ab   :  { %v1239_v23 = vsel %vm683_vm6, %v1238_v8, %v1234_v4 }
 0x2ac   :  { %v1227_v0 = vpop.permute.xlu1 %1226  ;;  %v1509_v34 = vpop.permute.xlu0 %1508 }
 0x2ad   :  { %v1243_v56 = vrot.slane %v1227_v0, %v3820_v53  ;;  %v1526_v26 = vrot.slane %v1509_v34, %v3817_v1 }
 0x2af   :  { %v1248_v61 = vsel %vm683_vm6, %v1247_v55, %v1243_v56 }
 0x2b0   :  { %v1451_v16 = vpop.permute.xlu1 %1450  ;;  %v1249_v11 = vsel %vm185_vm2, %v1248_v61, %v1239_v23  ;;  %v1549_v5 = vpop.permute.xlu0 %1548 }
 0x2b1   :  { %v3894_v28 = vadd.f32 %v1249_v11, %v1202_v14  ;;  %v1464_v25 = vrot.slane %v1451_v16, %v3820_v53  ;;  %v1562_v0 = vrot.slane %v1549_v5, %v3820_v53 }
 0x2b3   :  { %v1252_v38 = vsel %vm874_vm7, %v3894_v28, -inf  ;;  %v1469_v9 = vsel %vm683_vm6, %v1468_v2, %v1464_v25 }
 0x2b4   :  { %v1457_v13 = vpop.permute.xlu1 %1456  ;;  %1253 = vmax.xlane.f32.xlu0 %v1252_v38  ;;  %v1558_v50 = vpop.permute.xlu0 %1557 }
 0x2b5   :  { %v1473_v21 = vrot.slane %v1457_v13, %v3820_v53  ;;  %v1575_v10 = vrot.slane %v1558_v50, %v3817_v1 }
 0x2b7   :  { %v1478_v3 = vsel %vm683_vm6, %v1477_v57, %v1473_v21 }
 0x2b8   :  { %v1500_v43 = vpop.permute.xlu1 %1499  ;;  %v1601_v59 = vpop.permute.xlu0 %1600  ;;  %v1479_v24 = vsel %vm185_vm2, %v1478_v3, %v1469_v9  ;;  %v1868_v9 = vmul.f32 %v3771_v42, %v3622_v29  ;;  %v271_v42 = vrot.slane %v3790_v46, %v3431_v63 }
 0x2b9   :  { %v1513_v31 = vrot.slane %v1500_v43, %v3820_v53  ;;  %v1481_v56 = vadd.f32 %v1479_v24, %v3842_v52  ;;  %v1615_v16 = vrot.slane %v1601_v59, %v3817_v1 }
 0x2bb   :  { %v1518_v6 = vsel %vm683_vm6, %v1517_v36, %v1513_v31  ;;  %v1821_v31 = vmul.f32 %v3765_v40, %v3612_v20 }
 0x2bc   :  { %v1506_v47 = vpop.permute.xlu1 %1505  ;;  %v1607_v19 = vpop.permute.xlu0 %1606 }
 0x2bd   :  { %v1522_v41 = vrot.slane %v1506_v47, %v3820_v53  ;;  %v1624_v11 = vrot.slane %v1607_v19, %v3817_v1  ;;  %v1968_v19 = vmul.f32 %v3798_v27, %v3626_v35 }
 0x2bf   :  { %v1527_v37 = vsel %vm683_vm6, %v1526_v26, %v1522_v41  ;;  %v1819_v26 = vmul.f32 %v3760_v30, %v3612_v20  ;;  %v1917_v20 = vmul.f32 %v3781_v48, %v3624_v33 }
 0x2c0   :  { %v1552_v22 = vpop.permute.xlu1 %1551  ;;  %v1528_v55 = vsel %vm185_vm2, %v1527_v37, %v1518_v6  ;;  %v212_v37 = vrot.slane %v3802_v58, %v3357_v60  ;;  %v224_v30 = vpop.permute.xlu0 %223 }
 0x2c1   :  { %v1566_v39 = vrot.slane %v1552_v22, %v3817_v1  ;;  %v1530_v38 = vadd.f32 %v1528_v55, %v1481_v56  ;;  %v334_v55 = vrot.slane %v3790_v46, %v3404_v49 }
 0x2c2   :  { %v230_v40 = vmul.f32 %v224_v30, %v212_v37 }
 0x2c3   :  { %v1567_v18 = vsel %vm683_vm6, %v1566_v39, %v1562_v0  ;;  %v1870_v39 = vmul.f32 %v3776_v44, %v3622_v29  ;;  %v1919_v0 = vmul.f32 %v3786_v45, %v3624_v33  ;;  %v275_v29 = vrot.slane %v3802_v58, %v3431_v63 }
 0x2c4   :  { %v1555_v62 = vpop.permute.xlu1 %1554  ;;  %v1966_v44 = vmul.f32 %v3793_v51, %v3626_v35  ;;  %v338_v45 = vrot.slane %v3802_v58, %v3404_v49  ;;  %v401_v35 = vrot.slane %v3802_v58, %v3417_v54 }
 0x2c5   :  { %v1571_v32 = vrot.slane %v1555_v62, %v3820_v53 }
 0x2c7   :  { %v1576_v8 = vsel %vm683_vm6, %v1575_v10, %v1571_v32  ;;  %v208_v32 = vrot.slane %v3790_v46, %v3357_v60 }
 0x2c8   :  { %v1598_v4 = vpop.permute.xlu1 %1597  ;;  %v1577_v14 = vsel %vm185_vm2, %v1576_v8, %v1567_v18 }
 0x2c9   :  { %v1611_v23 = vrot.slane %v1598_v4, %v3820_v53  ;;  %v1579_v43 = vadd.f32 %v1577_v14, %v1530_v38  ;;  %v287_v4 = vpop.permute.xlu0 %286  ;;  %v228_v56 = vmul.f32 %v224_v30, %v208_v32 }
 0x2ca   :  { %v291_v6 = vmul.f32 %v287_v4, %v271_v42  ;;  %v293_v48 = vmul.f32 %v287_v4, %v275_v29 }
 0x2cb   :  { %v1616_v13 = vsel %vm683_vm6, %v1615_v16, %v1611_v23 }
 0x2cc   :  { %v1604_v61 = vpop.permute.xlu1 %1603 }
 0x2cd   :  { %v1620_v34 = vrot.slane %v1604_v61, %v3820_v53  ;;  %v350_v8 = vpop.permute.xlu0 %349  ;;  %v397_v61 = vrot.slane %v3790_v46, %v3417_v54 }
 0x2ce   :  { %v354_v33 = vmul.f32 %v350_v8, %v334_v55  ;;  %v356_v18 = vmul.f32 %v350_v8, %v338_v45 }
 0x2cf   :  { %v1625_v5 = vsel %vm683_vm6, %v1624_v11, %v1620_v34 }
 0x2d0   :  { %v3926_v47 = vpop.permute.xlu1 %1827  ;;  %v1626_v50 = vsel %vm185_vm2, %v1625_v5, %v1616_v13 }
 0x2d1   :  { %v3929_v22 = vadd.f32 %v1626_v50, %v1579_v43  ;;  %v413_v51 = vpop.permute.xlu0 %412 }
 0x2d2   :  { %v417_v16 = vmul.f32 %v413_v51, %v397_v61  ;;  %v419_v11 = vmul.f32 %v413_v51, %v401_v35 }
 0x2d3   :  { %v1629_v21 = vsel %vm874_vm7, %v3929_v22, -inf }
 0x2d4   :  { %v3933_v57 = vpop.permute.xlu1 %1833  ;;  %1630 = vmax.xlane.f32.xlu0 %v1629_v21 }
 0x2d5   :  { %v1850_v30 = vrot.slane %v3933_v57, %v3820_v53 }
 0x2d8   :  { %v3935_v25 = vpop.permute.xlu1 %1876 }
 0x2dc   :  { %v3937_v41 = vpop.permute.xlu1 %1882 }
 0x2e0   :  { %v3939_v2 = vpop.permute.xlu1 %1925 }
 0x2e4   :  { %v3941_v59 = vpop.permute.xlu1 %1931 }
 0x2e8   :  { %v3943_v62 = vpop.permute.xlu1 %1974 }
 0x2ea   :  { %1830 = vperm.xlu0 %2889, %v1819_v26  }
 0x2ec   :  { %v3947_v3 = vpop.permute.xlu1 %1980 }
 0x2ee   :  { %1836 = vperm.xlu0 %2889, %v1821_v31  }
 0x2f0   :  { %v220_v36 = vpop.permute.xlu1 %219 }
 0x2f1   :  { %v227_v10 = vmul.f32 %v220_v36, %v208_v32  ;;  %v229_v24 = vmul.f32 %v220_v36, %v212_v37  ;;  %v1841_v37 = vrot.slane %v3926_v47, %v3820_v53  ;;  %v1899_v47 = vrot.slane %v3937_v41, %v3820_v53 }
 0x2f2   :  { %1879 = vperm.xlu0 %2889, %v1868_v9   ;;  %v1939_v41 = vrot.slane %v3939_v2, %v3820_v53  ;;  %v1988_v2 = vrot.slane %v3943_v62, %v3820_v53 }
 0x2f3   :  { %236 = vperm.xlu1 %2888, %v227_v10  }
 0x2f4   :  { %v283_v23 = vpop.permute.xlu1 %282 }
 0x2f5   :  { %v290_v14 = vmul.f32 %v283_v23, %v271_v42  ;;  %v292_v27 = vmul.f32 %v283_v23, %v275_v29 }
 0x2f6   :  { %1885 = vperm.xlu0 %2889, %v1870_v39  }
 0x2f7   :  { %242 = vperm.xlu1 %2888, %v229_v24  }
 0x2f8   :  { %v346_v49 = vpop.permute.xlu1 %345 }
 0x2f9   :  { %v353_v34 = vmul.f32 %v346_v49, %v334_v55  ;;  %v355_v38 = vmul.f32 %v346_v49, %v338_v45 }
 0x2fa   :  { %1928 = vperm.xlu0 %2889, %v1917_v20  }
 0x2fb   :  { %245 = vperm.xlu1 %2888, %v230_v40  }
 0x2fc   :  { %v409_v13 = vpop.permute.xlu1 %408 }
 0x2fd   :  { %v416_v5 = vmul.f32 %v409_v13, %v397_v61  ;;  %v418_v46 = vmul.f32 %v409_v13, %v401_v35 }
 0x2fe   :  { %1934 = vperm.xlu0 %2889, %v1919_v0  }
 0x2ff   :  { %302 = vperm.xlu1 %2888, %v291_v6   ;;  %v1890_v6 = vrot.slane %v3935_v25, %v3820_v53 }
 0x302   :  { %1977 = vperm.xlu0 %2889, %v1966_v44  }
 0x303   :  { %308 = vperm.xlu1 %2888, %v293_v48  }
 0x306   :  { %1983 = vperm.xlu0 %2889, %v1968_v19  }
 0x307   :  { %365 = vperm.xlu1 %2888, %v354_v33  }
 0x30a   :  { %239 = vperm.xlu0 %2889, %v228_v56  }
 0x30b   :  { %371 = vperm.xlu1 %2888, %v356_v18   ;;  %v1948_v18 = vrot.slane %v3941_v59, %v3820_v53  ;;  %v1997_v59 = vrot.slane %v3947_v3, %v3820_v53 }
 0x30e   :  { %299 = vperm.xlu0 %2889, %v290_v14  }
 0x30f   :  { %428 = vperm.xlu1 %2888, %v417_v16  }
 0x312   :  { %305 = vperm.xlu0 %2889, %v292_v27  }
 0x313   :  { %434 = vperm.xlu1 %2888, %v419_v11  }
 0x316   :  { %362 = vperm.xlu0 %2889, %v353_v34  }
 0x31a   :  { %368 = vperm.xlu0 %2889, %v355_v38  }
 0x31e   :  { %425 = vperm.xlu0 %2889, %v416_v5  }
 0x322   :  { %431 = vperm.xlu0 %2889, %v418_v46  }
 0x32d   :  { %v877_v43 = vpop.xlane.xlu1 %876 }
 0x32e   :  { %v878_v50 = vsub.f32 %v3858_v7, %v877_v43 }
 0x330   :  { %v879_v21 = vmul.f32 1.442695, %v878_v50 }
 0x332   :  { %2969 = vpow2.f32 %v879_v21 }
 0x33c   :  { %v3980_v54 = vpop.eup %2969 }
 0x33d   :  { %882 = vrot.lane.b32.xlu1 %v3980_v54, %s3014_s12 }
 0x341   :  { %v1254_v58 = vpop.xlane.xlu0 %1253 }
 0x342   :  { %v1255_v26 = vsub.f32 %v3894_v28, %v1254_v58 }
 0x344   :  { %v1256_v31 = vmul.f32 1.442695, %v1255_v26 }
 0x346   :  { %2971 = vpow2.f32 %v1256_v31 }
 0x350   :  { %v3985_v32 = vpop.eup %2971 }
 0x351   :  { %1259 = vrot.lane.b32.xlu1 %v3985_v32, %s3014_s12 }
 0x361   :  { %v1631_v36 = vpop.xlane.xlu0 %1630 }
 0x362   :  { %v1632_v62 = vsub.f32 %v3929_v22, %v1631_v36 }
 0x364   :  { %v1633_v3 = vmul.f32 1.442695, %v1632_v62 }
 0x366   :  { %2973 = vpow2.f32 %v1633_v3 }
 0x369   :  { %v1831_v7 = vpop.permute.xlu0 %1830 }
 0x36a   :  { %v1845_v9 = vrot.slane %v1831_v7, %v3817_v1 }
 0x36c   :  { %v1846_v39 = vsel %vm683_vm6, %v1845_v9, %v1841_v37 }
 0x36d   :  { %v1837_v10 = vpop.permute.xlu0 %1836 }
 0x36e   :  { %v1854_v28 = vrot.slane %v1837_v10, %v3817_v1 }
 0x370   :  { %v1855_v24 = vsel %vm683_vm6, %v1854_v28, %v1850_v30 }
 0x371   :  { %v1856_v20 = vsel %vm185_vm2, %v1855_v24, %v1846_v39  ;;  %v1880_v40 = vpop.permute.xlu0 %1879 }
 0x372   :  { %v237_v4 = vpop.permute.xlu1 %236  ;;  %v1894_v42 = vrot.slane %v1880_v40, %v3817_v1  ;;  %v1858_v44 = vadd.f32 %v1856_v20, %v3842_v52 }
 0x373   :  { %v250_v10 = vrot.slane %v237_v4, %v3322_v15 }
 0x374   :  { %v1895_v48 = vsel %vm683_vm6, %v1894_v42, %v1890_v6 }
 0x375   :  { %v1886_v0 = vpop.permute.xlu0 %1885 }
 0x376   :  { %v1903_v57 = vrot.slane %v1886_v0, %v3817_v1  ;;  %v243_v29 = vpop.permute.xlu1 %242 }
 0x377   :  { %v259_v30 = vrot.slane %v243_v29, %v3322_v15 }
 0x378   :  { %v1904_v8 = vsel %vm683_vm6, %v1903_v57, %v1899_v47 }
 0x379   :  { %v1905_v55 = vsel %vm185_vm2, %v1904_v8, %v1895_v48  ;;  %v1929_v19 = vpop.permute.xlu0 %1928 }
 0x37a   :  { %v1907_v33 = vadd.f32 %v1905_v55, %v1858_v44  ;;  %v246_v45 = vpop.permute.xlu1 %245  ;;  %v1943_v56 = vrot.slane %v1929_v19, %v3817_v1 }
 0x37b   :  { %v263_v9 = vrot.slane %v246_v45, %v3318_v12 }
 0x37c   :  { %v1944_v51 = vsel %vm683_vm6, %v1943_v56, %v1939_v41  ;;  %v2974_v41 = vpop.eup %2973 }
 0x37d   :  { %v1935_v25 = vpop.permute.xlu0 %1934  ;;  %v264_v40 = vsel %vm120_vm1, %v263_v9, %v259_v30 }
 0x37e   :  { %v1952_v23 = vrot.slane %v1935_v25, %v3817_v1  ;;  %v303_v14 = vpop.permute.xlu1 %302 }
 0x37f   :  { %v317_v42 = vrot.slane %v303_v14, %v3318_v12 }
 0x380   :  { %v1953_v61 = vsel %vm683_vm6, %v1952_v23, %v1948_v18 }
 0x381   :  { %v1978_v16 = vpop.permute.xlu0 %1977  ;;  %v1954_v35 = vsel %vm185_vm2, %v1953_v61, %v1944_v51 }
 0x382   :  { %v1956_v27 = vadd.f32 %v1954_v35, %v1907_v33  ;;  %v1992_v11 = vrot.slane %v1978_v16, %v3817_v1  ;;  %v309_v38 = vpop.permute.xlu1 %308 }
 0x383   :  { %v326_v24 = vrot.slane %v309_v38, %v3318_v12 }
 0x384   :  { %v1993_v13 = vsel %vm683_vm6, %v1992_v11, %v1988_v2 }
 0x385   :  { %v1984_v49 = vpop.permute.xlu0 %1983 }
 0x386   :  { %v2001_v34 = vrot.slane %v1984_v49, %v3817_v1  ;;  %v366_v58 = vpop.permute.xlu1 %365 }
 0x387   :  { %v380_v29 = vrot.slane %v366_v58, %v3318_v12 }
 0x388   :  { %v2002_v5 = vsel %vm683_vm6, %v2001_v34, %v1997_v59 }
 0x389   :  { %v240_v46 = vpop.permute.xlu0 %239  ;;  %v2003_v43 = vsel %vm185_vm2, %v2002_v5, %v1993_v13 }
 0x38a   :  { %v2005_v50 = vadd.f32 %v2003_v43, %v1956_v27  ;;  %v372_v53 = vpop.permute.xlu1 %371  ;;  %v254_v7 = vrot.slane %v240_v46, %v3318_v12 }
 0x38b   :  { %v389_v4 = vrot.slane %v372_v53, %v3318_v12 }
 0x38c   :  { %v2006_v21 = vsel %vm874_vm7, %v2005_v50, -inf  ;;  %v255_v22 = vsel %vm120_vm1, %v254_v7, %v250_v10  ;;  %v2890_v7 = vld [vmem:[%s4280_s0 + $0x4] ss:$12 sps:$4 sm:$0xff]   ;;  %v2892_v10 = vld [vmem:[%s4280_s0] ss:$12 sps:$4 sm:$0xff]  }
 0x38d   :  { %2007 = vmax.xlane.f32.xlu0 %v2006_v21  ;;  %v300_v26 = vpop.permute.xlu0 %299  ;;  %v265_v47 = vsel %vm185_vm2, %v264_v40, %v255_v22  ;;  %2039 = vmatprep.subr.bf16.mxu0 %v2890_v7  ;;  %v2950_v7 = vld [vmem:[%s4280_s0 + $0x1e4] ss:$12 sps:$4 sm:$0xff]  }
 0x38e   :  { %v429_v28 = vpop.permute.xlu1 %428  ;;  %v313_v36 = vrot.slane %v300_v26, %v3322_v15  ;;  %v267_v19 = vadd.f32 %v265_v47, %v3842_v52  ;;  %2040 = vmatpush1.bf16.msra.mxu0 %v2892_v10  ;;  %v2911_v47 = vld [vmem:[%s4280_s0 + $0xac] ss:$12 sps:$4 sm:$0xff]  }
 0x38f   :  { %v443_v18 = vrot.slane %v429_v28, %v3318_v12  ;;  %v2954_v10 = vld [vmem:[%s4280_s0 + $0x80] ss:$12 sps:$4 sm:$0xff]  }
 0x390   :  { %v318_v44 = vsel %vm120_vm1, %v317_v42, %v313_v36  ;;  %v2905_v42 = vld [vmem:[%s4280_s0 + $0x7c] ss:$12 sps:$4 sm:$0xff]  }
 0x391   :  { %v306_v31 = vpop.permute.xlu0 %305  ;;  %2550 = vmatprep.subr.bf16.mxu1 %v2905_v42  ;;  %v2780_v42 = vld [vmem:[%s4281_s1 + $0x5] ss:$8 sm:$0x3] }
 0x392   :  { %v322_v37 = vrot.slane %v306_v31, %v3322_v15  ;;  %v435_v55 = vpop.permute.xlu1 %434 }
 0x393   :  { %v452_v23 = vrot.slane %v435_v55, %v3318_v12  ;;  %v2916_v55 = vld [vmem:[%s4280_s0 + $0xc0] ss:$12 sps:$4 sm:$0xff]  }
 0x394   :  { %v327_v0 = vsel %vm120_vm1, %v326_v24, %v322_v37  ;;  %v2895_v37 = vld [vmem:[%s4280_s0 + $0x1c] ss:$12 sps:$4 sm:$0xff]  }
 0x395   :  { %v363_v1 = vpop.permute.xlu0 %362  ;;  %v328_v8 = vsel %vm185_vm2, %v327_v0, %v318_v44  ;;  %2112 = vmatprep.subr.bf16.mxu0 %v2895_v37  ;;  %v2914_v44 = vld [vmem:[%s4280_s0 + $0xc4] ss:$12 sps:$4 sm:$0xff]  }
 0x396   :  { %v376_v6 = vrot.slane %v363_v1, %v3322_v15  ;;  %v330_v61 = vadd.f32 %v328_v8, %v267_v19  ;;  %v2955_v37 = vld [vmem:[%s4280_s0 + $0x158] ss:$12 sps:$4 sm:$0xff]  }
 0x398   :  { %v381_v33 = vsel %vm120_vm1, %v380_v29, %v376_v6  ;;  %v2910_v6 = vld [vmem:[%s4280_s0 + $0x90] ss:$12 sps:$4 sm:$0xff]  }
 0x399   :  { %v369_v39 = vpop.permute.xlu0 %368 }
 0x39a   :  { %v385_v20 = vrot.slane %v369_v39, %v3322_v15 }
 0x39c   :  { %v390_v48 = vsel %vm120_vm1, %v389_v4, %v385_v20  ;;  %v2907_v4 = vld [vmem:[%s4280_s0 + $0x78] ss:$12 sps:$4 sm:$0xff]  }
 0x39d   :  { %v426_v57 = vpop.permute.xlu0 %425  ;;  %v391_v25 = vsel %vm185_vm2, %v390_v48, %v381_v33  ;;  %2551 = vmatpush1.bf16.msra.mxu1 %v2907_v4  ;;  %v2917_v33 = vld [vmem:[%s4280_s0 + $0xdc] ss:$12 sps:$4 sm:$0xff]   ;;  %v2084_v4 = vrot.slane %v2780_v42, %v3357_v60 }
 0x39e   :  { %v439_v45 = vrot.slane %v426_v57, %v3322_v15  ;;  %v393_v16 = vadd.f32 %v391_v25, %v330_v61  ;;  %v2913_v57 = vld [vmem:[%s4280_s0 + $0xa8] ss:$12 sps:$4 sm:$0xff]   ;;  %v2923_v61 = vld [vmem:[%s4280_s0 + $0x10c] ss:$12 sps:$4 sm:$0xff]  }
 0x3a0   :  { %v444_v14 = vsel %vm120_vm1, %v443_v18, %v439_v45  ;;  %v2919_v18 = vld [vmem:[%s4280_s0 + $0xd8] ss:$12 sps:$4 sm:$0xff]  }
 0x3a1   :  { %v432_v56 = vpop.permute.xlu0 %431 }
 0x3a2   :  { %v448_v51 = vrot.slane %v432_v56, %v3322_v15  ;;  %v2893_v56 = vld [vmem:[%s4280_s0 + $0x18] ss:$12 sps:$4 sm:$0xff]  }
 0x3a3   :  { %1636 = vrot.lane.b32.xlu0 %v2974_v41, %s3014_s12 }
 0x3a4   :  { %v453_v52 = vsel %vm120_vm1, %v452_v23, %v448_v51  ;;  %v2920_v23 = vld [vmem:[%s4280_s0 + $0xf4] ss:$12 sps:$4 sm:$0xff]   ;;  %v2922_v51 = vld [vmem:[%s4280_s0 + $0xf0] ss:$12 sps:$4 sm:$0xff]  }
 0x3a5   :  { %v454_v35 = vsel %vm185_vm2, %v453_v52, %v444_v14  ;;  %v2925_v14 = vld [vmem:[%s4280_s0 + $0x108] ss:$12 sps:$4 sm:$0xff]   ;;  %v2926_v52 = vld [vmem:[%s4280_s0 + $0x124] ss:$12 sps:$4 sm:$0xff]  }
 0x3a6   :  { %v456_v27 = vadd.f32 %v454_v35, %v393_v16  ;;  %v2896_v16 = vld [vmem:[%s4280_s0 + $0x30] ss:$12 sps:$4 sm:$0xff]   ;;  %v2901_v35 = vld [vmem:[%s4280_s0 + $0x4c] ss:$12 sps:$4 sm:$0xff]  }
 0x3a8   :  { %v458_v11 = vsel %vm457_vm8, %v456_v27, -inf }
 0x3a9   :  { %459 = vmax.xlane.f32.xlu1 %v458_v11 }
 0x3af   :  { %v883_v49 = vpop.permute.xlu1 %882 }
 0x3b0   :  { %v885_v12 = vsel %vm457_vm8, %v883_v49, 0.0  ;;  %v2929_v49 = vld [vmem:[%s4280_s0 + $0x13c] ss:$12 sps:$4 sm:$0xff]  }
 0x3c2   :  { %886 = vadd.xlane.f32.xlu0 %v885_v12  ;;  %v2931_v12 = vld [vmem:[%s4280_s0 + $0x138] ss:$12 sps:$4 sm:$0xff]  }
 0x3c3   :  { %v1260_v5 = vpop.permute.xlu1 %1259 }
 0x3c4   :  { %v1262_v46 = vsel %vm457_vm8, %v1260_v5, 0.0  ;;  %v2941_v5 = vld [vmem:[%s4280_s0 + $0x19c] ss:$12 sps:$4 sm:$0xff]  }
 0x41a   :  { %v2008_v15 = vpop.xlane.xlu0 %2007 }
 0x41b   :  { %v2009_v2 = vsub.f32 %v2005_v50, %v2008_v15  ;;  %v2932_v15 = vld [vmem:[%s4280_s0 + $0x154] ss:$12 sps:$4 sm:$0xff]  }
 0x41d   :  { %v2010_v59 = vmul.f32 1.442695, %v2009_v2  ;;  %v2934_v2 = vld [vmem:[%s4280_s0 + $0x150] ss:$12 sps:$4 sm:$0xff]  }
 0x41e   :  { %v1637_v34 = vpop.permute.xlu0 %1636 }
 0x41f   :  { %2975 = vpow2.f32 %v2010_v59  ;;  %v1639_v38 = vsel %vm457_vm8, %v1637_v34, 0.0  ;;  %v2935_v59 = vld [vmem:[%s4280_s0 + $0x16c] ss:$12 sps:$4 sm:$0xff]   ;;  %v2937_v34 = vld [vmem:[%s4280_s0 + $0x168] ss:$12 sps:$4 sm:$0xff]  }
 0x420   :  { %1640 = vadd.xlane.f32.xlu0 %v1639_v38  ;;  %v2938_v38 = vld [vmem:[%s4280_s0 + $0x184] ss:$12 sps:$4 sm:$0xff]  }
 0x429   :  { %v2976_v13 = vpop.eup %2975 }
 0x42a   :  { %2013 = vrot.lane.b32.xlu1 %v2976_v13, %s3014_s12 }
 0x436   :  { %v460_v43 = vpop.xlane.xlu1 %459 }
 0x437   :  { %v461_v21 = vsub.f32 %v456_v27, %v460_v43  ;;  %v2928_v27 = vld [vmem:[%s4280_s0 + $0x120] ss:$12 sps:$4 sm:$0xff]   ;;  %v2904_v43 = vld [vmem:[%s4280_s0 + $0x64] ss:$12 sps:$4 sm:$0xff]  }
 0x439   :  { %v462_v58 = vmul.f32 1.442695, %v461_v21 }
 0x43b   :  { %2977 = vpow2.f32 %v462_v58  ;;  %v2943_v58 = vld [vmem:[%s4280_s0 + $0x198] ss:$12 sps:$4 sm:$0xff]  }
 0x445   :  { %v2978_v62 = vpop.eup %2977 }
 0x446   :  { %v464_v31 = vsel %vm457_vm8, %v2978_v62, 0.0 }
 0x44e   :  { %1263 = vadd.xlane.f32.xlu1 %v1262_v46  ;;  %v2899_v46 = vld [vmem:[%s4280_s0 + $0x48] ss:$12 sps:$4 sm:$0xff]  }
 0x44f   :  { %v887_v53 = vpop.xlane.xlu0 %886 }
 0x450   :  { %2979 = vrcp.f32 %v887_v53 }
 0x45a   :  { %v2980_v3 = vpop.eup %2979 }
 0x45b   :  { %v889_v1 = vmul.f32 %v2980_v3, %v3980_v54  ;;  %v2947_v3 = vld [vmem:[%s4280_s0 + $0x1cc] ss:$12 sps:$4 sm:$0xff]  }
 0x45d   :  { %v2095_v9 = vpack.c.bf16 %v889_v1, %v889_v1  ;;  %v2949_v1 = vld [vmem:[%s4280_s0 + $0x1c8] ss:$12 sps:$4 sm:$0xff]  }
 0x49c   :  { %v2014_v26 = vpop.permute.xlu1 %2013 }
 0x49d   :  { %v2016_v50 = vsel %vm457_vm8, %v2014_v26, 0.0  ;;  %v2944_v26 = vld [vmem:[%s4280_s0 + $0x1b4] ss:$12 sps:$4 sm:$0xff]  }
 0x49e   :  { %2017 = vadd.xlane.f32.xlu0 %v2016_v50  ;;  %v2946_v50 = vld [vmem:[%s4280_s0 + $0x1b0] ss:$12 sps:$4 sm:$0xff]  }
 0x4a2   :  { %465 = vadd.xlane.f32.xlu0 %v464_v31 }
 0x4ad   :  { %v1641_v30 = vpop.xlane.xlu0 %1640 }
 0x4ae   :  { %2981 = vrcp.f32 %v1641_v30  ;;  %v2956_v30 = vld [vmem:[%s4280_s0 + $0x98] ss:$12 sps:$4 sm:$0xff]  }
 0x4b8   :  { %2097 = vrot.lane.b32.xlu0 %v2095_v9, %s3014_s12  ;;  %v2982_v28 = vpop.eup %2981  ;;  %v2953_v9 = vld [vmem:[%s4280_s0 + $0x140] ss:$12 sps:$4 sm:$0xff]  }
 0x4b9   :  { %v1643_v36 = vmul.f32 %v2982_v28, %v2974_v41  ;;  %v2898_v41 = vld [vmem:[%s4280_s0 + $0x34] ss:$12 sps:$4 sm:$0xff]   ;;  %v2958_v28 = vld [vmem:[%s4280_s0 + $0xb0] ss:$12 sps:$4 sm:$0xff]  }
 0x4bb   :  { %v2219_v20 = vpack.c.bf16 %v1643_v36, %v1643_v36  ;;  %v2962_v36 = vld [vmem:[%s4280_s0 + $0xe0] ss:$12 sps:$4 sm:$0xff]  }
 0x4db   :  { %v1264_v54 = vpop.xlane.xlu1 %1263 }
 0x4dc   :  { %2983 = vrcp.f32 %v1264_v54  ;;  %v2957_v54 = vld [vmem:[%s4280_s0 + $0x170] ss:$12 sps:$4 sm:$0xff]  }
 0x4e6   :  { %v2984_v39 = vpop.eup %2983 }
 0x4e7   :  { %v1266_v24 = vmul.f32 %v2984_v39, %v3985_v32  ;;  %v2908_v32 = vld [vmem:[%s4280_s0 + $0x94] ss:$12 sps:$4 sm:$0xff]  }
 0x4e8   :  { %2552 = vmatprep.subr.bf16.mxu1 %v2908_v32  ;;  %v2959_v39 = vld [vmem:[%s4280_s0 + $0x188] ss:$12 sps:$4 sm:$0xff]   ;;  %v2088_v32 = vrot.slane %v2780_v42, %v3431_v63 }
 0x4e9   :  { %v2157_v22 = vpack.c.bf16 %v1266_v24, %v1266_v24  ;;  %2553 = vmatpush1.bf16.msra.mxu1 %v2910_v6  ;;  %v2960_v24 = vld [vmem:[%s4280_s0 + $0xc8] ss:$12 sps:$4 sm:$0xff]  }
 0x4ea   :  { %2554 = vmatprep.subr.bf16.mxu1 %v2911_v47 }
 0x4eb   :  { %2159 = vrot.lane.b32.xlu1 %v2157_v22, %s3014_s12  ;;  %v2961_v22 = vld [vmem:[%s4280_s0 + $0x1a0] ss:$12 sps:$4 sm:$0xff]  }
 0x4ed   :  { %2555 = vmatpush1.bf16.msra.mxu1 %v2913_v57 }
 0x4ee   :  { %2556 = vmatprep.subr.bf16.mxu1 %v2914_v44 }
 0x4ef   :  { %2221 = vrot.lane.b32.xlu1 %v2219_v20, %s3014_s12  ;;  %v2963_v20 = vld [vmem:[%s4280_s0 + $0x1b8] ss:$12 sps:$4 sm:$0xff]  }
 0x4f1   :  { %2557 = vmatpush1.bf16.msra.mxu1 %v2916_v55 }
 0x4f2   :  { %2558 = vmatprep.subr.bf16.mxu1 %v2917_v33  ;;  %v2965_v33 = vld [vmem:[%s4280_s0 + $0x1d0] ss:$12 sps:$4 sm:$0xff]  }
 0x4f5   :  { %2559 = vmatpush1.bf16.msra.mxu1 %v2919_v18 }
 0x4f6   :  { %2560 = vmatprep.subr.bf16.mxu1 %v2920_v23 }
 0x4f9   :  { %2561 = vmatpush1.bf16.msra.mxu1 %v2922_v51 }
 0x4fa   :  { %2562 = vmatprep.subr.bf16.mxu1 %v2923_v61 }
 0x4fd   :  { %2563 = vmatpush1.bf16.msra.mxu1 %v2925_v14 }
 0x4fe   :  { %2564 = vmatprep.subr.bf16.mxu1 %v2926_v52 }
 0x501   :  { %2565 = vmatpush1.bf16.msra.mxu1 %v2928_v27 }
 0x502   :  { %2566 = vmatprep.subr.bf16.mxu1 %v2929_v49 }
 0x505   :  { %2567 = vmatpush1.bf16.msra.mxu1 %v2931_v12 }
 0x506   :  { %2568 = vmatprep.subr.bf16.mxu1 %v2932_v15 }
 0x509   :  { %2569 = vmatpush1.bf16.msra.mxu1 %v2934_v2  ;;  %v2627_v2 = vld [vmem:[%s4281_s1 + $0x7] ss:$0 sm:$0xff] }
 0x50a   :  { %2570 = vmatprep.subr.bf16.mxu1 %v2935_v59 }
 0x50d   :  { %2571 = vmatpush1.bf16.msra.mxu1 %v2937_v34 }
 0x50e   :  { %2572 = vmatprep.subr.bf16.mxu1 %v2938_v38 }
 0x52b   :  { %v2018_v40 = vpop.xlane.xlu0 %2017 }
 0x52c   :  { %2985 = vrcp.f32 %v2018_v40  ;;  %v2964_v40 = vld [vmem:[%s4280_s0 + $0xf8] ss:$12 sps:$4 sm:$0xff]  }
 0x52f   :  { %v466_v0 = vpop.xlane.xlu0 %465 }
 0x530   :  { %2987 = vrcp.f32 %v466_v0 }
 0x533   :  { %v2098_v11 = vpop.permute.xlu0 %2097 }
 0x536   :  { %v2986_v29 = vpop.eup %2985 }
 0x537   :  { %v2020_v48 = vmul.f32 %v2986_v29, %v2976_v13  ;;  %v2940_v13 = vld [vmem:[%s4280_s0 + $0x180] ss:$12 sps:$4 sm:$0xff]  }
 0x538   :  { %2573 = vmatpush1.bf16.msra.mxu1 %v2940_v13 }
 0x539   :  { %v2281_v8 = vpack.c.bf16 %v2020_v48, %v2020_v48  ;;  %2574 = vmatprep.subr.bf16.mxu1 %v2941_v5 }
 0x53a   :  { %v2988_v19 = vpop.eup %2987 }
 0x53b   :  { %2283 = vrot.lane.b32.xlu0 %v2281_v8, %s3014_s12  ;;  %v468_v45 = vmul.f32 %v2988_v19, %v2978_v62  ;;  %v2902_v62 = vld [vmem:[%s4280_s0 + $0x60] ss:$12 sps:$4 sm:$0xff]  }
 0x53c   :  { %2575 = vmatpush1.bf16.msra.mxu1 %v2943_v58 }
 0x53d   :  { %v2025_v25 = vpack.c.bf16 %v468_v45, %v468_v45  ;;  %2576 = vmatprep.subr.bf16.mxu1 %v2944_v26  ;;  %v2966_v45 = vld [vmem:[%s4280_s0 + $0x110] ss:$12 sps:$4 sm:$0xff]  }
 0x53f   :  { %2783 = vmatmul.mubr.msk.bf16.vlgmr.msra.gmra.mrb[0].mxu0 %vm44_vm0, %v2025_v25  ;;  %v2968_v25 = vld [vmem:[%s4280_s0 + $0x128] ss:$12 sps:$4 sm:$0xff]  }
 0x540   :  { %2113 = vmatpush1.bf16.msra.mxu0 %v2893_v56  ;;  %2144 = vmatprep.mubr.bf16.mxu0 %v3013_v17  ;;  %v2967_v56 = vld [vmem:[%s4280_s0 + $0x1e8] ss:$12 sps:$4 sm:$0xff]  }
 0x541   :  { %2174 = vmatprep.subr.bf16.mxu0 %v2898_v41  ;;  %2577 = vmatpush1.bf16.msra.mxu1 %v2946_v50  ;;  %v2796_v41 = vld [vmem:[%s4281_s1 + $0x6] ss:$8 sm:$0x3] }
 0x542   :  { %2578 = vmatprep.subr.bf16.mxu1 %v2947_v3  ;;  %v2383_v18 = vrot.slane %v2796_v41, %v3357_v60  ;;  %v2387_v23 = vrot.slane %v2796_v41, %v3431_v63 }
 0x545   :  { %2579 = vmatpush1.bf16.msra.mxu1 %v2949_v1 }
 0x546   :  { %2580 = vmatprep.subr.bf16.mxu1 %v2950_v7 }
 0x54b   :  { %2786 = vmatmul.mubr.msk.bf16.vlgmr.msra.gmra.mrb[0].mxu0 %vm44_vm0, %v2098_v11 }
 0x54c   :  { %2175 = vmatpush1.bf16.msra.mxu0 %v2896_v16  ;;  %2206 = vmatprep.mubr.bf16.mxu0 %v3013_v17 }
 0x54d   :  { %2236 = vmatprep.subr.bf16.mxu0 %v2901_v35 }
 0x55d   :  { %v2160_v21 = vpop.permute.xlu1 %2159 }
 0x55e   :  { %2789 = vmatmul.mubr.msk.bf16.vlgmr.msra.gmra.mrb[0].mxu0 %vm44_vm0, %v2160_v21 }
 0x55f   :  { %2237 = vmatpush1.bf16.msra.mxu0 %v2899_v46  ;;  %2268 = vmatprep.mubr.bf16.mxu0 %v3013_v17 }
 0x560   :  { %2298 = vmatprep.subr.bf16.mxu0 %v2904_v43 }
 0x561   :  { %v2222_v31 = vpop.permute.xlu1 %2221 }
 0x56a   :  { %2792 = vmatmul.mubr.msk.bf16.vlgmr.msra.gmra.mrb[0].mxu0 %vm44_vm0, %v2222_v31 }
 0x56b   :  { %2299 = vmatpush1.bf16.msra.mxu0 %v2902_v62  ;;  %2330 = vmatprep.mubr.bf16.mxu0 %v3013_v17  ;;  %v2952_v17 = vld [vmem:[%s4280_s0 + $0x1e0] ss:$12 sps:$4 sm:$0xff]  }
 0x56c   :  { %2581 = vmatpush1.bf16.msra.mxu1 %v2952_v17  ;;  %2845 = vmatprep.subr.bf16.mxu0 %v2953_v9 }
 0x5ad   :  { %v2284_v53 = vpop.permute.xlu0 %2283 }
 0x5ae   :  { %2795 = vmatmul.mubr.msk.bf16.vlgmr.msra.gmra.mrb[0].mxu0 %vm44_vm0, %v2284_v53 }
 0x5af   :  { %2846 = vmatpush3.bf16.msra.mxu0 %v2954_v10 }
 0x5b0   :  { %2847 = vmatprep.subr.bf16.mxu0 %v2955_v37 }
 0x5b3   :  { %2848 = vmatpush3.bf16.msra.mxu0 %v2956_v30 }
 0x5b4   :  { %2849 = vmatprep.subr.bf16.mxu0 %v2957_v54 }
 0x5b7   :  { %2850 = vmatpush3.bf16.msra.mxu0 %v2958_v28 }
 0x5b8   :  { %2851 = vmatprep.subr.bf16.mxu0 %v2959_v39 }
 0x5bb   :  { %2852 = vmatpush3.bf16.msra.mxu0 %v2960_v24 }
 0x5bc   :  { %2853 = vmatprep.subr.bf16.mxu0 %v2961_v22 }
 0x5bf   :  { %2854 = vmatpush3.bf16.msra.mxu0 %v2962_v36 }
 0x5c0   :  { %2855 = vmatprep.subr.bf16.mxu0 %v2963_v20 }
 0x5c3   :  { %2856 = vmatpush3.bf16.msra.mxu0 %v2964_v40 }
 0x5c4   :  { %2857 = vmatprep.subr.bf16.mxu0 %v2965_v33 }
 0x5c7   :  { %2858 = vmatpush3.bf16.msra.mxu0 %v2966_v45 }
 0x5c8   :  { %2859 = vmatprep.subr.bf16.mxu0 %v2967_v56 }
 0x5cb   :  { %2860 = vmatpush3.bf16.msra.mxu0 %v2968_v25 }
 0x681   :  { %v2332_v0 = vpop.f32.mrb[0].mxu0 }
 0x682   :  { %v2867_v6 = vadd.f32 %v2332_v0, %v2084_v4  ;;  %v2334_v47 = vpop.f32.mrb[1].mxu0 }
 0x683   :  { %v2868_v57 = vadd.f32 %v2334_v47, %v2088_v32  ;;  %v2336_v29 = vpop.f32.mrb[2].mxu0 }
 0x684   :  { %v2341_v44 = vmax.f32 %v2867_v6, 0.0  ;;  %v2337_v48 = vpop.f32.mrb[3].mxu0 }
 0x685   :  { %v2342_v8 = vmax.f32 %v2868_v57, 0.0 }
 0x686   :  { %v2343_v19 = vpack.c.bf16 %v2341_v44, %v2341_v44 }
 0x687   :  { %v2344_v55 = vpack.c.bf16 %v2342_v8, %v2342_v8 }
 0x689   :  { %2582 = vmatprep.mubr.bf16.mxu1 %v2344_v55 }
 0x68a   :  { %2583 = vmatmul.mubr.bf16.vlgmr.msra.gmra.mrb[0].mxu1 %v2343_v19 }
 0x75d   :  { %v2584_v51 = vpop.f32.mrb[0].mxu1 }
 0x75e   :  { %v2585_v61 = vadd.f32 %v2584_v51, %v2383_v18  ;;  %v2586_v14 = vpop.f32.mrb[1].mxu1 }
 0x75f   :  { %v2587_v52 = vadd.f32 %v2586_v14, %v2387_v23  ;;  %v2588_v16 = vpop.f32.mrb[2].mxu1 }
 0x760   :  { %v2591_v35 = vmax.f32 %v2585_v61, 0.0  ;;  %v2589_v27 = vpop.f32.mrb[3].mxu1 }
 0x761   :  { %v2592_v11 = vmax.f32 %v2587_v52, 0.0 }
 0x762   :  { %v2593_v12 = vpack.c.bf16 %v2591_v35, %v2591_v35 }
 0x763   :  { %v2594_v49 = vpack.c.bf16 %v2592_v11, %v2592_v11 }
 0x765   :  { %2756 = vmatprep.mubr.bf16.mxu0 %v2594_v49 }
 0x766   :  { %2757 = vmatmul.mubr.bf16.vlgmr.msra.gmra.mrb[4].mxu0 %v2593_v12 }
 0x839   :  { %v2861_v15 = vpop.f32.mrb[4].mxu0 }
 0x83a   :  { %v2862_v60 = vpop.f32.mrb[5].mxu0 }
 0x83b   :  { %v2863_v59 = vadd.f32 %v2862_v60, %v2861_v15  ;;  %v2864_v63 = vpop.f32.mrb[6].mxu0 }
 0x83c   :  { %v2865_v34 = vpop.f32.mrb[7].mxu0 }
 0x83d   :  { %v2759_v38 = vadd.f32 %v2863_v59, %v2627_v2 }
 0x83f   :  { %v2764_v13 = vmax.f32 %v2759_v38, 0.0 }
 0x841   :  { %2765 = vst.msk [vmem:[#allocation2] sm:$0x3] %vm457_vm8, %v2764_v13 }
 0x842   :  { %3000 = shalt.err (!%p2997_p4)
}
 0x843   :  { %s3001_s24 = scalar_lea.hbm %s4287_s7, 32 }
 0x844   :  { %p3002_p5 = scmp.ne.s32.totalorder %s4287_s7, %s3001_s24  ;;  %p3005_p6 = scmp.lt.u32.totalorder %s3001_s24, %s4287_s7 }
 0x846   :  { %p3007_p7 = pnand %p3005_p6, %p3002_p5 }
 0x848   :  { %3010 = shalt.err (!%p3007_p7)
}
 0x849   :  { %2775 = dma.vmem_to_hbm [thread:$0]  %s2773_s21, 32, %s4287_s7, [#allocation3]  }
 0x84a   :  { %3011 = dma.done.wait [#allocation3], 32  }
 0x84b   :  { %3012 = vsyncadd [#allocation3], 4294967264 }
 0x84c   :  { %2779 = vsyncpa [#allocation3], 1 }

</bundles_post_ra>
